<compile_context>
chip_gen: v5e
topology: v5e:2x2
jax: 0.10.0
libtpu: 0.0.40
codegen_flags: <defaults>
</compile_context>

<pallas_src>
import math

import jax
import jax.numpy as jnp
from jax.experimental import pallas as pl
from jax.experimental.pallas import tpu as pltpu


def _outer_product_kernel(x_ref, w_ref, o_ref):
    # x_ref: (F, E, tb) f32 | w_ref: (P*E, E) f32 | o_ref: (P, tb) f32
    # Field sum over the leading F axis: F-1 full-width VPU adds on lane-dense
    # (E, tb) slabs.  (The astype is a no-op for f32 x; it keeps accumulation
    # in f32 if a caller hands x over in bf16 to halve x HBM traffic.)
    f_t = jnp.sum(x_ref[...].astype(jnp.float32), axis=0)              # (E, tb)

    # Stage 1: (P*E, E) @ (E, tb) on the MXU, f32 operands / f32 accumulate.
    # K = E = 32 underfills the MXU, but stage-1 FLOPs are trivial, so full
    # f32 precision is free here.
    g = jnp.dot(w_ref[...], f_t, preferred_element_type=jnp.float32)   # (P*E, tb)

    p_out, tb = o_ref.shape
    e = f_t.shape[0]
    # Split the sublane axis P*E -> (P, E); E is a multiple of 8, so this is
    # layout preserving (no lane relayout).
    g3 = g.reshape(p_out, e, tb)                                        # (P, E, tb)

    # Stage 2: broadcast f_t over the leading P axis (vreg reuse, no data
    # movement) and sublane-reduce over E on the VPU.
    o_ref[...] = jnp.sum(g3 * f_t[None, :, :], axis=1).astype(o_ref.dtype)


def _pick_batch_tile(batch):
    # Largest lane-dense tile (multiple of 128, 1024 preferred) that divides
    # the batch; prefer an even grid with >= 2 steps so both v7x TensorCores
    # get equal work from dimension_semantics=("parallel",).
    cands = (1024, 512, 256, 128)
    for cand in cands:
        if batch % cand == 0 and (batch // cand) >= 2 and (batch // cand) % 2 == 0:
            return cand
    for cand in cands:
        if batch % cand == 0 and (batch // cand) >= 2:
            return cand
    for cand in cands:
        if batch % cand == 0:
            return cand
    return batch  # tiny / ragged batch: one full-extent block (still correct)


def outer_product(x, weights, *, tb=None, return_transposed=False):
    """x: (B, F, E); weights: (P, E, E) f32 or pre-reshaped (P*E, E).

    Returns op: (B, P) f32, matching the PyTorch OuterProduct.forward
    (or the raw (P, B) kernel output if return_transposed=True).
    """
    B, F, E = x.shape
    if weights.ndim == 3:
        P = weights.shape[0]
        w2 = weights.reshape(P * E, E)   # contiguous reshape, no transpose
    else:
        w2 = weights
        P = w2.shape[0] // E
    assert w2.shape == (P * E, E)

    if tb is None:
        tb = _pick_batch_tile(B)
    assert B % tb == 0
    grid = (B // tb,)

    # Batch-minor layout: one XLA transpose of x outside the kernel (a single
    # read+write of x) replaces the per-tile sublane field-reduce + cross-lane
    # f_sigma transpose the kernel paid for batch-major x.
    x_t = jnp.transpose(x, (1, 2, 0))                                   # (F, E, B)

    flops = 2 * B * (P * E) * E + 2 * B * P * E + B * F * E
    bytes_accessed = (
        x.size * x.dtype.itemsize + w2.size * w2.dtype.itemsize + B * P * 4
    )

    out_t = pl.pallas_call(
        _outer_product_kernel,
        out_shape=jax.ShapeDtypeStruct((P, B), jnp.float32),
        grid_spec=pltpu.PrefetchScalarGridSpec(
            num_scalar_prefetch=0,
            grid=grid,
            in_specs=[
                # x block: lane-dense over the batch tile.
                pl.BlockSpec((F, E, tb), lambda i: (0, 0, i)),
                # Grid-invariant weight block: index never changes -> DMA'd once.
                pl.BlockSpec((P * E, E), lambda i: (0, 0)),
            ],
            out_specs=pl.BlockSpec((P, tb), lambda i: (0, i)),
        ),
        compiler_params=pltpu.CompilerParams(
            dimension_semantics=("parallel",),
            # Resident set (x double-buffer + weight + output double-buffer +
            # stage-1/2 intermediates) is ~6 MiB even at tb=1024; 32 MiB is
            # safe on v5e/v6e (128 MiB VMEM) and v7x (64 MiB VMEM).
            vmem_limit_bytes=32 * 1024 * 1024,
        ),
        cost_estimate=pl.CostEstimate(
            flops=flops, transcendentals=0, bytes_accessed=bytes_accessed
        ),
    )(x_t, w2)

    if return_transposed:
        return out_t
    # (P, B) -> (B, P): tiny layout-plumbing transpose outside the kernel.
    return out_t.T


def xavier_uniform(key, shape):
    """Replicates torch.nn.init.xavier_uniform_ for a (P, E, E) tensor."""
    receptive = 1
    for s in shape[2:]:
        receptive *= s
    fan_in = shape[1] * receptive
    fan_out = shape[0] * receptive
    bound = math.sqrt(6.0 / (fan_in + fan_out))
    return jax.random.uniform(
        key, shape, dtype=jnp.float32, minval=-bound, maxval=bound
    )


def reference(x, weights):
    f_sigma = jnp.sum(x, axis=1)
    p = jnp.einsum("re,rm->rem", f_sigma, f_sigma)
    return jnp.einsum("rem,pem->rp", p, weights)


if __name__ == "__main__":
    # batch, n_fields, embedding_size, output_size
    B, F, E, P = 512, 8, 32, 16

    key = jax.random.PRNGKey(0)
    kx, kw = jax.random.split(key)
    x = jax.random.normal(kx, (B, F, E), dtype=jnp.float32)
    weights = xavier_uniform(kw, (P, E, E))

    out = jax.block_until_ready(jax.jit(outer_product)(x, weights))
    ref = reference(x, weights)

    assert out.shape == (B, P)
    err = float(jnp.max(jnp.abs(out - ref)))
    scale = float(jnp.max(jnp.abs(ref)))
    # f32 stage-1 matmul + f32 stage-2 keeps the actual error far below this
    # (tolerance left generous as a smoke-test bound).
    assert err <= 0.02 * scale + 1e-3, f"max abs err {err} (scale {scale})"
    print("KERNEL_OK")
</pallas_src>

<mosaic_0001>
module attributes {stable_mosaic.version = 11 : i64} {
  func.func @_outer_product_kernel(%arg0: i32, %arg1: memref<8x32x256xf32, #tpu.memory_space<vmem>>, %arg2: memref<512x32xf32, #tpu.memory_space<vmem>>, %arg3: memref<16x256xf32, #tpu.memory_space<vmem>>) attributes {dimension_semantics = [#tpu.dimension_semantics<parallel>], iteration_bounds = array<i64: 2>, scalar_prefetch = 0 : i64, scratch_operands = 0 : i64, tpu.core_type = #tpu.core_type<tc>, window_params = [{transform_indices = @transform_0, window_bounds = array<i64: 8, 32, 256>}, {pipeline_mode = #tpu.pipeline_mode<synchronous>, transform_indices = @transform_1, window_bounds = array<i64: 512, 32>}, {transform_indices = @transform_2, window_bounds = array<i64: 16, 256>}]} {
    %c0 = arith.constant 0 : index
    %c0_0 = arith.constant 0 : index
    %c0_1 = arith.constant 0 : index
    %0 = vector.load %arg1[%c0, %c0_0, %c0_1] : memref<8x32x256xf32, #tpu.memory_space<vmem>>, vector<8x32x256xf32>
    %cst = arith.constant dense<0.000000e+00> : vector<32x256xf32>
    %1 = vector.multi_reduction <add>, %0, %cst [0] : vector<8x32x256xf32> to vector<32x256xf32>
    %c0_2 = arith.constant 0 : index
    %c0_3 = arith.constant 0 : index
    %2 = vector.load %arg2[%c0_2, %c0_3] : memref<512x32xf32, #tpu.memory_space<vmem>>, vector<512x32xf32>
    %cst_4 = arith.constant dense<0.000000e+00> : vector<512x256xf32>
    %3 = tpu.matmul %2, %1, %cst_4 {dimension_numbers = #tpu.dot_dimension_numbers<[1], [0], [0], [1], [0, 0, 1, 1], [], []>} : vector<512x32xf32>, vector<32x256xf32>, vector<512x256xf32> -> vector<512x256xf32>
    %4 = vector.shape_cast %3 : vector<512x256xf32> to vector<16x32x256xf32>
    %5 = vector.shape_cast %1 : vector<32x256xf32> to vector<1x32x256xf32>
    %6 = vector.broadcast %5 : vector<1x32x256xf32> to vector<16x32x256xf32>
    %7 = arith.mulf %4, %6 : vector<16x32x256xf32>
    %cst_5 = arith.constant dense<0.000000e+00> : vector<16x256xf32>
    %8 = vector.multi_reduction <add>, %7, %cst_5 [1] : vector<16x32x256xf32> to vector<16x256xf32>
    %c0_6 = arith.constant 0 : index
    %c0_7 = arith.constant 0 : index
    %9 = vector.load %arg3[%c0_6, %c0_7] : memref<16x256xf32, #tpu.memory_space<vmem>>, vector<16x256xf32>
    tpu.vector_store %arg3[%c0_6, %c0_7], %8 {strides = array<i32>} : memref<16x256xf32, #tpu.memory_space<vmem>>, vector<16x256xf32>,
    return
  }
  func.func @transform_0(%arg0: i32) -> (i32, i32, i32) {
    %c0_i32 = arith.constant 0 : i32
    %c0_i32_0 = arith.constant 0 : i32
    %c0_i32_1 = arith.constant 0 : i32
    return %c0_i32, %c0_i32_0, %arg0 : i32, i32, i32
  }
  func.func @transform_1(%arg0: i32) -> (i32, i32) {
    %c0_i32 = arith.constant 0 : i32
    %c0_i32_0 = arith.constant 0 : i32
    %c0_i32_1 = arith.constant 0 : i32
    return %c0_i32, %c0_i32_0 : i32, i32
  }
  func.func @transform_2(%arg0: i32) -> (i32, i32) {
    %c0_i32 = arith.constant 0 : i32
    %c0_i32_0 = arith.constant 0 : i32
    return %c0_i32, %arg0 : i32, i32
  }
}

</mosaic_0001>

<bundles_post_ra>
// kernel: outer_product.1
= control target key start
LH: loop header
LB: loop body
LE: loop exit
PB: predicated region body
PF: predicated region fallthrough
CT: control target
= control target key end

     0   :  { %7 = vsyncpa [#allocation3], 0  ;;  %s2570_s0 = inlined_call_operand.hbm [shape: f32[8,32,512], index: 0, kind: input, shape index: {}]   ;;  %s2571_s1 = inlined_call_operand.hbm [shape: f32[512,32], index: 1, kind: input, shape index: {}]   ;;  %s2572_s2 = inlined_call_operand.hbm [shape: f32[16,512], index: 2, kind: output, shape index: {}]  }
   0x1   :  { %9 = vsyncpa [#allocation3 + $0x1], 0 }
   0x2   :  { %10 = vsyncpa [#allocation6], 0 }
   0x3   :  { %11 = vsyncpa [#allocation4], 0 }
   0x4   :  { %13 = vsyncpa [#allocation4 + $0x1], 0  ;;  %s1943_s9 = smov 0   ;;  %s1945_s10 = smov 0  }
   0x5   :  { %s1947_s11 = smov 0   ;;  %s1949_s12 = smov 0  }
   0x6 LB: > { %s1964_s13 = sadd.s32 4294967295, %s1917_s12   ;;  %s1568_s14 = sadd.s32 4294967294, %s1917_s12   ;;  %s1917_s12 = sphi %s1949_s12, %s2582_s12   ;;  %s1913_s11 = sphi %s1947_s11, %s2581_s11   ;;  %s1909_s10 = sphi %s1945_s10, %s2580_s10   ;;  %s1905_s9 = sphi %s1943_s9, %s2579_s9  }
   0x7   : > { %p39_p0 = scmp.ne.s32.totalorder %s1909_s10, %s1905_s9  ;;  %p40_p1 = scmp.eq.s32.totalorder %s1964_s13, 0 }
   0x8   : > { %p84_p2 = scmp.eq.s32.totalorder %s1964_s13, 1  ;;  %p90_p3 = scmp.eq.s32.totalorder %s1568_s14, 1 }
   0x9   : > { %p1973_p4 = por %p40_p1, %p39_p0  ;;  %p1569_p5 = scmp.ge.s32.totalorder %s1917_s12, 1 }
   0xa   : > { %p1978_p6 = por %p90_p3, %p39_p0  ;;  %p97_p7 = scmp.lt.s32.totalorder %s1917_s12, 3 }
   0xb   : > { %s108_s19 = sshll.u32 %s2571_s1, 4  ;;  %s1919_s21 = smov [#allocation5]   ;;  %s109_s19 = int_to_ptr.hbm [resolvable:$true] %s108_s19 }
   0xc   : > { %p1986_p8 = pnand %p1569_p5, %p97_p7  ;;  %s110_s22 = sshll.u32 %s1919_s21, 4  ;;  %s111_s22 = int_to_ptr.vmem [resolvable:$true] %s110_s22 }
   0xd   : > { %s1996_s23 = sadd.s32 1, %s1917_s12   ;;  %s1920_s24 = smov 128  }
   0xe   : > { %p1730_p9 = pneg %p1986_p8  ;;  %s1921_s25 = smov 8  }
   0xf   : > { %s23_s26 = ssub.s32 %s1917_s12, %s1996_s23  ;;  %s26_s27 = sadd.s32 1, %s1913_s11 }
  0x10   : > { %p1731_p10 = pnand %p1730_p9, %p40_p1  ;;  %p24_p12 = scmp.eq.s32.totalorder %s23_s26, 0 }
  0x11   : > { %p33_p13 = scmp.ne.s32.totalorder %s1913_s11, %s1909_s10  ;;  %p34_p0 = scmp.eq.s32.totalorder %s1917_s12, 0 }
  0x12   : > { %1733 = dma.hbm_to_vmem [thread:$0]  (!%p1731_p10), %s109_s19, 8192, %s111_s22, [#allocation6], %s1920_s24, %s1920_s24, %s1921_s25  }
  0x13   : > { %p1743_p3 = scmp.lt.s32.totalorder %s1917_s12, 2  ;;  %p35_p5 = por %p34_p0, %p33_p13 }
  0x14   : > { %s2006_s28 = scalar_select %p24_p12, %s1913_s11, %s26_s27  }
  0x15   : > { %p2010_p7 = por %p84_p2, %p33_p13  ;;  %s124_s30 = sand.u32 1, %s1913_s11  }
  0x16   : > { %s1712_s3 = sshll.u32 %s1917_s12, 4  ;;  %s1572_s4 = sshll.u32 %s124_s30, 9 }
  0x17   : > { %s133_s7 = scalar_lea.hbm %s2570_s0, %s1712_s3  ;;  %s128_s14 = scalar_lea.vmem [#allocation2], %s1572_s4 }
  0x18   : > { %s134_s8 = sshll.u32 %s133_s7, 4  ;;  %s136_s17 = sshll.u32 %s128_s14, 4  ;;  %s135_s8 = int_to_ptr.hbm [resolvable:$true] %s134_s8  ;;  %s137_s17 = int_to_ptr.vmem [resolvable:$true] %s136_s17 }
  0x19   : > { %p2021_p9 = pnand %p1743_p3, %p35_p5  ;;  %s125_s19 = scalar_lea.sflag [#allocation3], %s124_s30 }
  0x1a   : > { %s1817_s21 = sshra.s32 %s135_s8, 4  ;;  %s1824_s26 = scalar_lea.hbm %s2570_s0, 1024  ;;  %s1818_s21 = int_to_ptr.hbm [resolvable:$true] %s1817_s21 }
  0x1b   : > { %s1819_s22 = scalar_lea.hbm %s1818_s21, 512  ;;  %p1821_p10 = pneg %p2021_p9 }
  0x1c   : > { %p1820_p2 = scmp.ne.s32.totalorder %s1818_s21, %s1819_s22  ;;  %p1825_p0 = scmp.lt.s32.totalorder %s1818_s21, %s2570_s0 }
  0x1d   : > { %p1826_p3 = scmp.lt.s32.totalorder %s1824_s26, %s1819_s22 }
  0x1e   : > { %p1822_p12 = pnand %p1821_p10, %p1820_p2 }
  0x1f   : > { %p1827_p5 = por %p1826_p3, %p1825_p0 }
  0x20   : > { %p1823_p13 = pneg %p1822_p12 }
  0x22   : > { %p1828_p11 = pnand %p1827_p5, %p1823_p13 }
  0x24   : > { %1831 = shalt.err (!%p1828_p11)
}
  0x25   : > { %s1922_s30 = smov 512   ;;  %s1923_s4 = smov 256  }
  0x26   : > { %s1924_s5 = smov 16   ;;  %148 = sbr.rel (%p1986_p8) target bundleno = 481 (0x1e1), region = 28 }
  0x27   : > { %1737 = dma.hbm_to_vmem [thread:$0]  (!%p2021_p9), %s135_s8, 8192, %s137_s17, %s125_s19, %s1922_s30, %s1923_s4, %s1924_s5  }
  0x28   : > { %s2038_s6 = sand.u32 (!%p1986_p8), 1, %s1909_s10  }
  0x29   : > { %s1576_s7 = sshll.u32 (!%p1986_p8), %s2038_s6, 9  ;;  %s151_s14 = scalar_lea.sflag (!%p1986_p8), [#allocation3], %s2038_s6 }
  0x2a   : > { %s2042_s21 = scalar_lea.vmem (!%p1986_p8), [#allocation2], %s1576_s7 }
  0x2b   : > { %1892 = dma.done.wait (%p1973_p4), %s151_s14, 8192  }
  0x2c   : > { %1894 = vsyncadd (%p1973_p4), %s151_s14, 4294959104 }
  0x2d   : > { %1896 = dma.done.wait (%p40_p1), [#allocation6], 8192  }
  0x2e   : > { %1898 = vsyncadd (%p40_p1), [#allocation6], 4294959104  ;;  %v189_v0 = vld [vmem:[%s2042_s21 + $0x30] sm:$0xff]  ;;  %v190_v5 = vld [vmem:[%s2042_s21 + $0x38] sm:$0xff]  ;;  %vm367_vm0 = vcmask 261120   ;;  %vm1426_vm1 = vcmask 1041409  }
  0x2f   : > { %v197_v1 = vld [vmem:[%s2042_s21 + $0x70] sm:$0xff]  ;;  %v198_v7 = vld [vmem:[%s2042_s21 + $0x78] sm:$0xff]  ;;  %v187_v13 = vld [vmem:[%s2042_s21 + $0x20] sm:$0xff]  ;;  %vm1428_vm2 = vcmask 1042434   ;;  %vm1430_vm3 = vcmask 1043459   ;;  %vm1432_vm4 = vcmask 1044484  }
  0x30   : > { %v205_v2 = vld [vmem:[%s2042_s21 + $0xb0] sm:$0xff]  ;;  %v289_v3 = vadd.f32 %v197_v1, %v189_v0  ;;  %v206_v8 = vld [vmem:[%s2042_s21 + $0xb8] sm:$0xff]  ;;  %v296_v10 = vadd.f32 %v198_v7, %v190_v5  ;;  %v195_v14 = vld [vmem:[%s2042_s21 + $0x60] sm:$0xff]  ;;  %vm1434_vm5 = vcmask 1045509   ;;  %s1578_s15 = sshll.u32 %s2038_s6, 5  ;;  %vm1436_vm6 = vcmask 1046534  }
  0x31   : > { %v213_v4 = vld [vmem:[%s2042_s21 + $0xf0] sm:$0xff]  ;;  %v214_v12 = vld [vmem:[%s2042_s21 + $0xf8] sm:$0xff]  ;;  %v203_v17 = vld [vmem:[%s2042_s21 + $0xa0] sm:$0xff]  ;;  %v275_v18 = vadd.f32 %v195_v14, %v187_v13  ;;  %vm1438_vm7 = vcmask 1047559   ;;  %s1713_s20 = sshll.u32 %s1964_s13, 4  ;;  %s180_s8 = scalar_lea.vmem [#allocation7], %s1578_s15 }
  0x32   : > { %v290_v6 = vadd.f32 %v289_v3, %v205_v2  ;;  %v221_v9 = vld [vmem:[%s2042_s21 + $0x130] sm:$0xff]  ;;  %v297_v16 = vadd.f32 %v296_v10, %v206_v8  ;;  %v222_v21 = vld [vmem:[%s2042_s21 + $0x138] sm:$0xff]  ;;  %v211_v22 = vld [vmem:[%s2042_s21 + $0xe0] sm:$0xff]  ;;  %s1481_s19 = scalar_lea.hbm %s2572_s2, %s1713_s20  ;;  %s1482_s13 = sshll.u32 %s180_s8, 4  ;;  %s1483_s13 = int_to_ptr.vmem [resolvable:$true] %s1482_s13 }
  0x33   : > { %v229_v15 = vld [vmem:[%s2042_s21 + $0x170] sm:$0xff]  ;;  %v276_v24 = vadd.f32 %v275_v18, %v203_v17  ;;  %v188_v25 = vld [vmem:[%s2042_s21 + $0x28] sm:$0xff]  ;;  %v230_v30 = vld [vmem:[%s2042_s21 + $0x178] sm:$0xff]  ;;  %s1484_s22 = sshll.u32 %s1481_s19, 4  ;;  %s1470_s24 = scalar_lea.sflag [#allocation4], %s2038_s6  ;;  %s1485_s22 = int_to_ptr.hbm [resolvable:$true] %s1484_s22 }
  0x34   : > { %v291_v11 = vadd.f32 %v290_v6, %v213_v4  ;;  %v237_v19 = vld [vmem:[%s2042_s21 + $0x1b0] sm:$0xff]  ;;  %v298_v23 = vadd.f32 %v297_v16, %v214_v12  ;;  %v196_v26 = vld [vmem:[%s2042_s21 + $0x68] sm:$0xff]  ;;  %v219_v31 = vld [vmem:[%s2042_s21 + $0x120] sm:$0xff]  ;;  %s1861_s25 = sshra.s32 %s1485_s22, 4  ;;  %s1867_s30 = scalar_lea.hbm %s2572_s2, 64  ;;  %s1862_s25 = int_to_ptr.hbm [resolvable:$true] %s1861_s25 }
  0x35   : > { %v204_v27 = vld [vmem:[%s2042_s21 + $0xa8] sm:$0xff]  ;;  %v245_v28 = vld [vmem:[%s2042_s21 + $0x1f0] sm:$0xff]  ;;  %v282_v32 = vadd.f32 %v196_v26, %v188_v25  ;;  %v238_v33 = vld [vmem:[%s2042_s21 + $0x1b8] sm:$0xff]  ;;  %v277_v35 = vadd.f32 %v276_v24, %v211_v22  ;;  %s1863_s26 = scalar_lea.hbm %s1862_s25, 32  ;;  %p1868_p11 = scmp.lt.s32.totalorder %s1862_s25, %s2572_s2 }
  0x36   : > { %v292_v20 = vadd.f32 %v291_v11, %v221_v9  ;;  %v299_v34 = vadd.f32 %v298_v23, %v222_v21  ;;  %v212_v36 = vld [vmem:[%s2042_s21 + $0xe8] sm:$0xff]  ;;  %v185_v37 = vld [vmem:[%s2042_s21 + $0x10] sm:$0xff]  ;;  %v227_v39 = vld [vmem:[%s2042_s21 + $0x160] sm:$0xff]  ;;  %p1864_p1 = scmp.ne.s32.totalorder %s1862_s25, %s1863_s26  ;;  %p1869_p9 = scmp.lt.s32.totalorder %s1867_s30, %s1863_s26 }
  0x37   : > { %v283_v40 = vadd.f32 %v282_v32, %v204_v27  ;;  %v193_v41 = vld [vmem:[%s2042_s21 + $0x50] sm:$0xff]  ;;  %v246_v43 = vld [vmem:[%s2042_s21 + $0x1f8] sm:$0xff]  ;;  %v235_v45 = vld [vmem:[%s2042_s21 + $0x1a0] sm:$0xff]  ;;  %v278_v46 = vadd.f32 %v277_v35, %v219_v31 }
  0x38   : > { %v293_v29 = vadd.f32 %v292_v20, %v229_v15  ;;  %v201_v42 = vld [vmem:[%s2042_s21 + $0x90] sm:$0xff]  ;;  %v300_v44 = vadd.f32 %v299_v34, %v230_v30  ;;  %v220_v47 = vld [vmem:[%s2042_s21 + $0x128] sm:$0xff]  ;;  %v261_v48 = vadd.f32 %v193_v41, %v185_v37  ;;  %v186_v52 = vld [vmem:[%s2042_s21 + $0x18] sm:$0xff]  ;;  %p1865_p4 = pnand %p1864_p1, %p2010_p7  ;;  %p1870_p2 = por %p1869_p9, %p1868_p11 }
  0x39   : > { %v284_v50 = vadd.f32 %v283_v40, %v212_v36  ;;  %v209_v51 = vld [vmem:[%s2042_s21 + $0xd0] sm:$0xff]  ;;  %v194_v53 = vld [vmem:[%s2042_s21 + $0x58] sm:$0xff]  ;;  %v243_v55 = vld [vmem:[%s2042_s21 + $0x1e0] sm:$0xff]  ;;  %v279_v56 = vadd.f32 %v278_v46, %v227_v39 }
  0x3a   : > { %v294_v38 = vadd.f32 %v293_v29, %v237_v19  ;;  %v301_v54 = vadd.f32 %v300_v44, %v238_v33  ;;  %v228_v57 = vld [vmem:[%s2042_s21 + $0x168] sm:$0xff]  ;;  %v262_v58 = vadd.f32 %v261_v48, %v201_v42  ;;  %v202_v59 = vld [vmem:[%s2042_s21 + $0x98] sm:$0xff]  ;;  %v268_v60 = vadd.f32 %v194_v53, %v186_v52  ;;  %v217_v63 = vld [vmem:[%s2042_s21 + $0x110] sm:$0xff]  ;;  %p1866_p8 = pneg %p1865_p4 }
  0x3b   : > { %v236_v61 = vld [vmem:[%s2042_s21 + $0x1a8] sm:$0xff]  ;;  %v285_v62 = vadd.f32 %v284_v50, %v220_v47  ;;  %v210_v0 = vld [vmem:[%s2042_s21 + $0xd8] sm:$0xff]  ;;  %v280_v2 = vadd.f32 %v279_v56, %v235_v45  ;;  %v183_v5 = vld [vmem:[%s2042_s21] sm:$0xff] }
  0x3c   : > { %v2083_v49 = vadd.f32 %v294_v38, %v245_v28  ;;  %v2096_v1 = vadd.f32 %v301_v54, %v246_v43  ;;  %v263_v3 = vadd.f32 %v262_v58, %v209_v51  ;;  %v269_v4 = vadd.f32 %v268_v60, %v202_v59  ;;  %v191_v6 = vld [vmem:[%s2042_s21 + $0x40] sm:$0xff]  ;;  %v244_v8 = vld [vmem:[%s2042_s21 + $0x1e8] sm:$0xff]  ;;  %v225_v10 = vld [vmem:[%s2042_s21 + $0x150] sm:$0xff]  ;;  %p1871_p10 = pnand %p1870_p2, %p1866_p8 }
  0x3d   : > { %v199_v7 = vld [vmem:[%s2042_s21 + $0x80] sm:$0xff]  ;;  %v286_v9 = vadd.f32 %v285_v62, %v228_v57  ;;  %v218_v11 = vld [vmem:[%s2042_s21 + $0x118] sm:$0xff]  ;;  %v247_v12 = vadd.f32 %v191_v6, %v183_v5  ;;  %v2106_v13 = vadd.f32 %v280_v2, %v243_v55  ;;  %v233_v14 = vld [vmem:[%s2042_s21 + $0x190] sm:$0xff] }
  0x3e   : > { %572 = vmatpush.msra.mxu0 %v2083_v49  ;;  %1714 = vmatpush.msra.mxu2 %v2083_v49  ;;  %v264_v15 = vadd.f32 %v263_v3, %v217_v63  ;;  %v270_v16 = vadd.f32 %v269_v4, %v210_v0  ;;  %v207_v17 = vld [vmem:[%s2042_s21 + $0xc0] sm:$0xff]  ;;  %v184_v18 = vld [vmem:[%s2042_s21 + $0x8] sm:$0xff]  ;;  %v226_v20 = vld [vmem:[%s2042_s21 + $0x158] sm:$0xff] }
  0x3f   : > { %781 = vmatpush.msra.mxu1 %v2096_v1  ;;  %1718 = vmatpush.msra.mxu3 %v2096_v1  ;;  %v287_v19 = vadd.f32 %v286_v9, %v236_v61  ;;  %v248_v21 = vadd.f32 %v247_v12, %v199_v7  ;;  %v192_v22 = vld [vmem:[%s2042_s21 + $0x48] sm:$0xff]  ;;  %v215_v26 = vld [vmem:[%s2042_s21 + $0x100] sm:$0xff]  ;;  %v241_v29 = vld [vmem:[%s2042_s21 + $0x1d0] sm:$0xff] }
  0x40   : > { %v200_v23 = vld [vmem:[%s2042_s21 + $0x88] sm:$0xff]  ;;  %573 = vmatpush.msra.mxu0 %v2106_v13  ;;  %1715 = vmatpush.msra.mxu2 %v2106_v13  ;;  %v265_v24 = vadd.f32 %v264_v15, %v225_v10  ;;  %v271_v25 = vadd.f32 %v270_v16, %v218_v11  ;;  %v254_v27 = vadd.f32 %v192_v22, %v184_v18  ;;  %v234_v30 = vld [vmem:[%s2042_s21 + $0x198] sm:$0xff]  ;;  %v223_v35 = vld [vmem:[%s2042_s21 + $0x140] sm:$0xff] }
  0x41   : > { %v2117_v28 = vadd.f32 %v287_v19, %v244_v8  ;;  %v249_v31 = vadd.f32 %v248_v21, %v207_v17  ;;  %v208_v32 = vld [vmem:[%s2042_s21 + $0xc8] sm:$0xff]  ;;  %v242_v37 = vld [vmem:[%s2042_s21 + $0x1d8] sm:$0xff]  ;;  %v231_v42 = vld [vmem:[%s2042_s21 + $0x180] sm:$0xff] }
  0x42   : > { %v266_v33 = vadd.f32 %v265_v24, %v233_v14  ;;  %v272_v34 = vadd.f32 %v271_v25, %v226_v20  ;;  %v255_v36 = vadd.f32 %v254_v27, %v200_v23  ;;  %v216_v39 = vld [vmem:[%s2042_s21 + $0x108] sm:$0xff]  ;;  %v239_v47 = vld [vmem:[%s2042_s21 + $0x1c0] sm:$0xff]  ;;  %v305_v61 = vld [vmem:[#allocation5 + $0x10] sm:$0xff] }
  0x43   : > { %782 = vmatpush.msra.mxu1 %v2117_v28  ;;  %1719 = vmatpush.msra.mxu3 %v2117_v28  ;;  %v250_v38 = vadd.f32 %v249_v31, %v215_v26  ;;  %v224_v45 = vld [vmem:[%s2042_s21 + $0x148] sm:$0xff]  ;;  %v303_v55 = vld [vmem:[#allocation5] sm:$0xff]  ;;  %v337_v62 = vld [vmem:[#allocation5 + $0x110] sm:$0xff] }
  0x44   : > { %v2127_v40 = vadd.f32 %v266_v33, %v241_v29  ;;  %v273_v41 = vadd.f32 %v272_v34, %v234_v30  ;;  %v256_v43 = vadd.f32 %v255_v36, %v208_v32  ;;  %v232_v51 = vld [vmem:[%s2042_s21 + $0x188] sm:$0xff]  ;;  %v335_v56 = vld [vmem:[#allocation5 + $0x100] sm:$0xff]  ;;  %v306_v63 = vld [vmem:[#allocation5 + $0x18] sm:$0xff] }
  0x45   : > { %v251_v44 = vadd.f32 %v250_v38, %v223_v35  ;;  %v240_v54 = vld [vmem:[%s2042_s21 + $0x1c8] sm:$0xff]  ;;  %v338_v0 = vld [vmem:[#allocation5 + $0x118] sm:$0xff]  ;;  %v307_v2 = vld [vmem:[#allocation5 + $0x20] sm:$0xff] }
  0x46   : > { %574 = vmatpush.msra.mxu0 %v2127_v40  ;;  %1716 = vmatpush.msra.mxu2 %v2127_v40  ;;  %v2133_v46 = vadd.f32 %v273_v41, %v242_v37  ;;  %v257_v48 = vadd.f32 %v256_v43, %v216_v39  ;;  %v304_v59 = vld [vmem:[#allocation5 + $0x8] sm:$0xff]  ;;  %v339_v3 = vld [vmem:[#allocation5 + $0x120] sm:$0xff]  ;;  %v309_v6 = vld [vmem:[#allocation5 + $0x30] sm:$0xff] }
  0x47   : > { %v252_v50 = vadd.f32 %v251_v44, %v231_v42  ;;  %v336_v60 = vld [vmem:[#allocation5 + $0x108] sm:$0xff]  ;;  %v341_v7 = vld [vmem:[#allocation5 + $0x130] sm:$0xff]  ;;  %v310_v8 = vld [vmem:[#allocation5 + $0x38] sm:$0xff] }
  0x48   : > { %783 = vmatpush.msra.mxu1 %v2133_v46  ;;  %1720 = vmatpush.msra.mxu3 %v2133_v46  ;;  %v258_v52 = vadd.f32 %v257_v48, %v224_v45  ;;  %v308_v4 = vld [vmem:[#allocation5 + $0x28] sm:$0xff]  ;;  %v342_v9 = vld [vmem:[#allocation5 + $0x138] sm:$0xff]  ;;  %v311_v10 = vld [vmem:[#allocation5 + $0x40] sm:$0xff] }
  0x49   : > { %v2139_v53 = vadd.f32 %v252_v50, %v239_v47  ;;  %v340_v5 = vld [vmem:[#allocation5 + $0x128] sm:$0xff]  ;;  %v343_v11 = vld [vmem:[#allocation5 + $0x140] sm:$0xff]  ;;  %v313_v15 = vld [vmem:[#allocation5 + $0x50] sm:$0xff] }
  0x4a   : > { %v259_v57 = vadd.f32 %v258_v52, %v232_v51  ;;  %v312_v12 = vld [vmem:[#allocation5 + $0x48] sm:$0xff]  ;;  %v345_v16 = vld [vmem:[#allocation5 + $0x150] sm:$0xff]  ;;  %v314_v17 = vld [vmem:[#allocation5 + $0x58] sm:$0xff] }
  0x4b   : > { %575 = vmatpush.msra.mxu0 %v2139_v53  ;;  %1717 = vmatpush.msra.mxu2 %v2139_v53  ;;  %v344_v14 = vld [vmem:[#allocation5 + $0x148] sm:$0xff]  ;;  %v346_v18 = vld [vmem:[#allocation5 + $0x158] sm:$0xff]  ;;  %v315_v19 = vld [vmem:[#allocation5 + $0x60] sm:$0xff] }
  0x4c   : > { %v2144_v58 = vadd.f32 %v259_v57, %v240_v54  ;;  %1579 = vmatmul.msk.f32.vlgmr.msra.gmra.mxu0 %vm367_vm0, %v303_v55  ;;  %1611 = vmatmul.msk.f32.vlgmr.msra.gmra.mxu2 %vm367_vm0, %v335_v56  ;;  %v347_v20 = vld [vmem:[#allocation5 + $0x160] sm:$0xff]  ;;  %v316_v21 = vld [vmem:[#allocation5 + $0x68] sm:$0xff]  ;;  %v317_v23 = vld [vmem:[#allocation5 + $0x70] sm:$0xff] }
  0x4d   : > { %v348_v22 = vld [vmem:[#allocation5 + $0x168] sm:$0xff]  ;;  %v349_v24 = vld [vmem:[#allocation5 + $0x170] sm:$0xff]  ;;  %v318_v25 = vld [vmem:[#allocation5 + $0x78] sm:$0xff] }
  0x4e   : > { %784 = vmatpush.msra.mxu1 %v2144_v58  ;;  %1721 = vmatpush.msra.mxu3 %v2144_v58  ;;  %v350_v26 = vld [vmem:[#allocation5 + $0x178] sm:$0xff]  ;;  %v319_v29 = vld [vmem:[#allocation5 + $0x80] sm:$0xff]  ;;  %v320_v34 = vld [vmem:[#allocation5 + $0x88] sm:$0xff] }
  0x4f   : > { %1643 = vmatmul.msk.f32.vlgmr.msra.gmra.mxu1 %vm367_vm0, %v303_v55  ;;  %1675 = vmatmul.msk.f32.vlgmr.msra.gmra.mxu3 %vm367_vm0, %v335_v56  ;;  %v351_v30 = vld [vmem:[#allocation5 + $0x180] sm:$0xff]  ;;  %v352_v35 = vld [vmem:[#allocation5 + $0x188] sm:$0xff]  ;;  %v321_v43 = vld [vmem:[#allocation5 + $0x90] sm:$0xff] }
  0x50   : > { %v353_v44 = vld [vmem:[#allocation5 + $0x190] sm:$0xff]  ;;  %v322_v57 = vld [vmem:[#allocation5 + $0x98] sm:$0xff] }
  0x54   : > { %1580 = vmatmul.msk.f32.gmra.mxu0 %vm367_vm0, %v304_v59  ;;  %1612 = vmatmul.msk.f32.gmra.mxu2 %vm367_vm0, %v336_v60 }
  0x57   : > { %1644 = vmatmul.msk.f32.gmra.mxu1 %vm367_vm0, %v304_v59  ;;  %1676 = vmatmul.msk.f32.gmra.mxu3 %vm367_vm0, %v336_v60  ;;  %v354_v59 = vld [vmem:[#allocation5 + $0x198] sm:$0xff] }
  0x5c   : > { %1581 = vmatmul.msk.f32.gmra.mxu0 %vm367_vm0, %v305_v61  ;;  %1613 = vmatmul.msk.f32.gmra.mxu2 %vm367_vm0, %v337_v62 }
  0x5f   : > { %1645 = vmatmul.msk.f32.gmra.mxu1 %vm367_vm0, %v305_v61  ;;  %1677 = vmatmul.msk.f32.gmra.mxu3 %vm367_vm0, %v337_v62 }
  0x64   : > { %1582 = vmatmul.msk.f32.gmra.mxu0 %vm367_vm0, %v306_v63  ;;  %1614 = vmatmul.msk.f32.gmra.mxu2 %vm367_vm0, %v338_v0 }
  0x67   : > { %1646 = vmatmul.msk.f32.gmra.mxu1 %vm367_vm0, %v306_v63  ;;  %1678 = vmatmul.msk.f32.gmra.mxu3 %vm367_vm0, %v338_v0 }
  0x6c   : > { %1583 = vmatmul.msk.f32.gmra.mxu0 %vm367_vm0, %v307_v2  ;;  %1615 = vmatmul.msk.f32.gmra.mxu2 %vm367_vm0, %v339_v3 }
  0x6f   : > { %1647 = vmatmul.msk.f32.gmra.mxu1 %vm367_vm0, %v307_v2  ;;  %1679 = vmatmul.msk.f32.gmra.mxu3 %vm367_vm0, %v339_v3 }
  0x74   : > { %1584 = vmatmul.msk.f32.gmra.mxu0 %vm367_vm0, %v308_v4  ;;  %1616 = vmatmul.msk.f32.gmra.mxu2 %vm367_vm0, %v340_v5 }
  0x77   : > { %1648 = vmatmul.msk.f32.gmra.mxu1 %vm367_vm0, %v308_v4  ;;  %1680 = vmatmul.msk.f32.gmra.mxu3 %vm367_vm0, %v340_v5  ;;  %v323_v5 = vld [vmem:[#allocation5 + $0xa0] sm:$0xff] }
  0x7c   : > { %1585 = vmatmul.msk.f32.gmra.mxu0 %vm367_vm0, %v309_v6  ;;  %1617 = vmatmul.msk.f32.gmra.mxu2 %vm367_vm0, %v341_v7 }
  0x7f   : > { %1649 = vmatmul.msk.f32.gmra.mxu1 %vm367_vm0, %v309_v6  ;;  %1681 = vmatmul.msk.f32.gmra.mxu3 %vm367_vm0, %v341_v7  ;;  %v355_v6 = vld [vmem:[#allocation5 + $0x1a0] sm:$0xff] }
  0x84   : > { %1586 = vmatmul.msk.f32.gmra.mxu0 %vm367_vm0, %v310_v8  ;;  %1618 = vmatmul.msk.f32.gmra.mxu2 %vm367_vm0, %v342_v9 }
  0x87   : > { %1650 = vmatmul.msk.f32.gmra.mxu1 %vm367_vm0, %v310_v8  ;;  %1682 = vmatmul.msk.f32.gmra.mxu3 %vm367_vm0, %v342_v9 }
  0x8c   : > { %1587 = vmatmul.msk.f32.gmra.mxu0 %vm367_vm0, %v311_v10  ;;  %1619 = vmatmul.msk.f32.gmra.mxu2 %vm367_vm0, %v343_v11 }
  0x8f   : > { %1651 = vmatmul.msk.f32.gmra.mxu1 %vm367_vm0, %v311_v10  ;;  %1683 = vmatmul.msk.f32.gmra.mxu3 %vm367_vm0, %v343_v11 }
  0x94   : > { %1588 = vmatmul.msk.f32.gmra.mxu0 %vm367_vm0, %v312_v12  ;;  %1620 = vmatmul.msk.f32.gmra.mxu2 %vm367_vm0, %v344_v14 }
  0x97   : > { %1652 = vmatmul.msk.f32.gmra.mxu1 %vm367_vm0, %v312_v12  ;;  %1684 = vmatmul.msk.f32.gmra.mxu3 %vm367_vm0, %v344_v14 }
  0x9c   : > { %1589 = vmatmul.msk.f32.gmra.mxu0 %vm367_vm0, %v313_v15  ;;  %1621 = vmatmul.msk.f32.gmra.mxu2 %vm367_vm0, %v345_v16 }
  0x9f   : > { %1653 = vmatmul.msk.f32.gmra.mxu1 %vm367_vm0, %v313_v15  ;;  %1685 = vmatmul.msk.f32.gmra.mxu3 %vm367_vm0, %v345_v16  ;;  %v324_v15 = vld [vmem:[#allocation5 + $0xa8] sm:$0xff] }
  0xa0   : > { %v356_v16 = vld [vmem:[#allocation5 + $0x1a8] sm:$0xff] }
  0xa4   : > { %1590 = vmatmul.msk.f32.gmra.mxu0 %vm367_vm0, %v314_v17  ;;  %1622 = vmatmul.msk.f32.gmra.mxu2 %vm367_vm0, %v346_v18 }
  0xa7   : > { %1654 = vmatmul.msk.f32.gmra.mxu1 %vm367_vm0, %v314_v17  ;;  %1686 = vmatmul.msk.f32.gmra.mxu3 %vm367_vm0, %v346_v18 }
  0xac   : > { %1591 = vmatmul.msk.f32.gmra.mxu0 %vm367_vm0, %v315_v19  ;;  %1623 = vmatmul.msk.f32.gmra.mxu2 %vm367_vm0, %v347_v20 }
  0xaf   : > { %1655 = vmatmul.msk.f32.gmra.mxu1 %vm367_vm0, %v315_v19  ;;  %1687 = vmatmul.msk.f32.gmra.mxu3 %vm367_vm0, %v347_v20 }
  0xb4   : > { %1592 = vmatmul.msk.f32.gmra.mxu0 %vm367_vm0, %v316_v21  ;;  %1624 = vmatmul.msk.f32.gmra.mxu2 %vm367_vm0, %v348_v22 }
  0xb7   : > { %1656 = vmatmul.msk.f32.gmra.mxu1 %vm367_vm0, %v316_v21  ;;  %1688 = vmatmul.msk.f32.gmra.mxu3 %vm367_vm0, %v348_v22 }
  0xbc   : > { %1593 = vmatmul.msk.f32.gmra.mxu0 %vm367_vm0, %v317_v23  ;;  %1625 = vmatmul.msk.f32.gmra.mxu2 %vm367_vm0, %v349_v24 }
  0xbf   : > { %1657 = vmatmul.msk.f32.gmra.mxu1 %vm367_vm0, %v317_v23  ;;  %1689 = vmatmul.msk.f32.gmra.mxu3 %vm367_vm0, %v349_v24  ;;  %v325_v23 = vld [vmem:[#allocation5 + $0xb0] sm:$0xff] }
  0xc0   : > { %v357_v24 = vld [vmem:[#allocation5 + $0x1b0] sm:$0xff] }
  0xc4   : > { %1594 = vmatmul.msk.f32.gmra.mxu0 %vm367_vm0, %v318_v25  ;;  %1626 = vmatmul.msk.f32.gmra.mxu2 %vm367_vm0, %v350_v26 }
  0xc7   : > { %1658 = vmatmul.msk.f32.gmra.mxu1 %vm367_vm0, %v318_v25  ;;  %1690 = vmatmul.msk.f32.gmra.mxu3 %vm367_vm0, %v350_v26 }
  0xc9   : > { %v2212_v27 = vpop.f32.mrf.mxu0 }
  0xcc   : > { %v2214_v31 = vpop.f32.mrf.mxu1  ;;  %1595 = vmatmul.msk.f32.gmra.mxu0 %vm367_vm0, %v319_v29  ;;  %1627 = vmatmul.msk.f32.gmra.mxu2 %vm367_vm0, %v351_v30 }
  0xcf   : > { %1659 = vmatmul.msk.f32.gmra.mxu1 %vm367_vm0, %v319_v29  ;;  %1691 = vmatmul.msk.f32.gmra.mxu3 %vm367_vm0, %v351_v30  ;;  %v673_v32 = vpop.f32.mrf.mxu2 }
  0xd0   : > { %v1042_v39 = vmul.f32 %v673_v32, %v2139_v53 }
  0xd1   : > { %v2220_v33 = vpop.f32.mrf.mxu0 }
  0xd2   : > { %v882_v36 = vpop.f32.mrf.mxu3 }
  0xd3   : > { %v1043_v48 = vmul.f32 %v882_v36, %v2144_v58 }
  0xd4   : > { %v2222_v37 = vpop.f32.mrf.mxu1  ;;  %1596 = vmatmul.msk.f32.gmra.mxu0 %vm367_vm0, %v320_v34  ;;  %1628 = vmatmul.msk.f32.gmra.mxu2 %vm367_vm0, %v352_v35 }
  0xd7   : > { %1660 = vmatmul.msk.f32.gmra.mxu1 %vm367_vm0, %v320_v34  ;;  %1692 = vmatmul.msk.f32.gmra.mxu3 %vm367_vm0, %v352_v35  ;;  %v676_v38 = vpop.f32.mrf.mxu2 }
  0xd8   : > { %v1044_v41 = vmul.f32 %v676_v38, %v2127_v40 }
  0xd9   : > { %v2230_v42 = vpop.f32.mrf.mxu0 }
  0xda   : > { %v1250_v45 = vadd.f32 %v1044_v41, %v1042_v39  ;;  %v885_v47 = vpop.f32.mrf.mxu3  ;;  %v326_v39 = vld [vmem:[#allocation5 + $0xb8] sm:$0xff] }
  0xdb   : > { %v1045_v50 = vmul.f32 %v885_v47, %v2133_v46  ;;  %v358_v41 = vld [vmem:[#allocation5 + $0x1b8] sm:$0xff] }
  0xdc   : > { %v2234_v51 = vpop.f32.mrf.mxu1  ;;  %1597 = vmatmul.msk.f32.gmra.mxu0 %vm367_vm0, %v321_v43  ;;  %1629 = vmatmul.msk.f32.gmra.mxu2 %vm367_vm0, %v353_v44 }
  0xdd   : > { %v1259_v52 = vadd.f32 %v1045_v50, %v1043_v48 }
  0xdf   : > { %1661 = vmatmul.msk.f32.gmra.mxu1 %vm367_vm0, %v321_v43  ;;  %1693 = vmatmul.msk.f32.gmra.mxu3 %vm367_vm0, %v353_v44  ;;  %v679_v54 = vpop.f32.mrf.mxu2 }
  0xe0   : > { %v1046_v55 = vmul.f32 %v679_v54, %v2106_v13 }
  0xe1   : > { %v2241_v56 = vpop.f32.mrf.mxu0 }
  0xe2   : > { %v1251_v60 = vadd.f32 %v1250_v45, %v1046_v55  ;;  %v888_v61 = vpop.f32.mrf.mxu3 }
  0xe3   : > { %v1047_v62 = vmul.f32 %v888_v61, %v2117_v28  ;;  %v327_v61 = vld [vmem:[#allocation5 + $0xc0] sm:$0xff] }
  0xe4   : > { %v2244_v63 = vpop.f32.mrf.mxu1  ;;  %1598 = vmatmul.msk.f32.gmra.mxu0 %vm367_vm0, %v322_v57  ;;  %1630 = vmatmul.msk.f32.gmra.mxu2 %vm367_vm0, %v354_v59 }
  0xe5   : > { %v1260_v0 = vadd.f32 %v1259_v52, %v1047_v62  ;;  %v359_v62 = vld [vmem:[#allocation5 + $0x1c0] sm:$0xff] }
  0xe7   : > { %1662 = vmatmul.msk.f32.gmra.mxu1 %vm367_vm0, %v322_v57  ;;  %1694 = vmatmul.msk.f32.gmra.mxu3 %vm367_vm0, %v354_v59  ;;  %v682_v2 = vpop.f32.mrf.mxu2 }
  0xe8   : > { %v1048_v3 = vmul.f32 %v682_v2, %v2083_v49 }
  0xe9   : > { %v2251_v4 = vpop.f32.mrf.mxu0 }
  0xea   : > { %v1252_v7 = vadd.f32 %v1251_v60, %v1048_v3  ;;  %v891_v8 = vpop.f32.mrf.mxu3 }
  0xeb   : > { %v1049_v9 = vmul.f32 %v891_v8, %v2096_v1 }
  0xec   : > { %v2254_v10 = vpop.f32.mrf.mxu1  ;;  %1599 = vmatmul.msk.f32.gmra.mxu0 %vm367_vm0, %v323_v5  ;;  %1631 = vmatmul.msk.f32.gmra.mxu2 %vm367_vm0, %v355_v6  ;;  %v1253_v43 = vrot.slane %v1252_v7, 4 }
  0xed   : > { %v1261_v11 = vadd.f32 %v1260_v0, %v1049_v9 }
  0xee   : > { %v1254_v54 = vadd.f32 %v1253_v43, %v1252_v7 }
  0xef   : > { %1663 = vmatmul.msk.f32.gmra.mxu1 %vm367_vm0, %v323_v5  ;;  %1695 = vmatmul.msk.f32.gmra.mxu3 %vm367_vm0, %v355_v6  ;;  %v685_v12 = vpop.f32.mrf.mxu2  ;;  %v1262_v50 = vrot.slane %v1261_v11, 4 }
  0xf0   : > { %v1050_v20 = vmul.f32 %v685_v12, %v2139_v53  ;;  %v1255_v0 = vrot.slane %v1254_v54, 2 }
  0xf1   : > { %v2260_v14 = vpop.f32.mrf.mxu0  ;;  %v1263_v59 = vadd.f32 %v1262_v50, %v1261_v11 }
  0xf2   : > { %v894_v17 = vpop.f32.mrf.mxu3  ;;  %v1256_v12 = vadd.f32 %v1255_v0, %v1254_v54 }
  0xf3   : > { %v1051_v29 = vmul.f32 %v894_v17, %v2144_v58  ;;  %v1264_v7 = vrot.slane %v1263_v59, 2 }
  0xf4   : > { %v2262_v18 = vpop.f32.mrf.mxu1  ;;  %1600 = vmatmul.msk.f32.gmra.mxu0 %vm367_vm0, %v324_v15  ;;  %1632 = vmatmul.msk.f32.gmra.mxu2 %vm367_vm0, %v356_v16 }
  0xf7   : > { %1664 = vmatmul.msk.f32.gmra.mxu1 %vm367_vm0, %v324_v15  ;;  %1696 = vmatmul.msk.f32.gmra.mxu3 %vm367_vm0, %v356_v16  ;;  %v688_v19 = vpop.f32.mrf.mxu2 }
  0xf8   : > { %v1052_v21 = vmul.f32 %v688_v19, %v2127_v40  ;;  %v1265_v19 = vadd.f32 %v1264_v7, %v1263_v59 }
  0xf9   : > { %v2270_v22 = vpop.f32.mrf.mxu0 }
  0xfa   : > { %v1268_v25 = vadd.f32 %v1052_v21, %v1050_v20  ;;  %v897_v26 = vpop.f32.mrf.mxu3  ;;  %v1266_v43 = vrot.slane %v1265_v19, 1 }
  0xfb   : > { %v1053_v30 = vmul.f32 %v897_v26, %v2133_v46 }
  0xfc   : > { %v2274_v32 = vpop.f32.mrf.mxu1  ;;  %1601 = vmatmul.msk.f32.gmra.mxu0 %vm367_vm0, %v325_v23  ;;  %1633 = vmatmul.msk.f32.gmra.mxu2 %vm367_vm0, %v357_v24 }
  0xfd   : > { %v1277_v34 = vadd.f32 %v1053_v30, %v1051_v29 }
  0xff   : > { %1665 = vmatmul.msk.f32.gmra.mxu1 %vm367_vm0, %v325_v23  ;;  %1697 = vmatmul.msk.f32.gmra.mxu3 %vm367_vm0, %v357_v24  ;;  %v691_v35 = vpop.f32.mrf.mxu2  ;;  %v328_v23 = vld [vmem:[#allocation5 + $0xc8] sm:$0xff] }
 0x100   : > { %v1054_v36 = vmul.f32 %v691_v35, %v2106_v13  ;;  %v360_v24 = vld [vmem:[#allocation5 + $0x1c8] sm:$0xff] }
 0x101   : > { %v2281_v38 = vpop.f32.mrf.mxu0 }
 0x102   : > { %v1269_v44 = vadd.f32 %v1268_v25, %v1054_v36  ;;  %v900_v45 = vpop.f32.mrf.mxu3  ;;  %v1257_v25 = vrot.slane %v1256_v12, 1 }
 0x103   : > { %v1055_v47 = vmul.f32 %v900_v45, %v2117_v28 }
 0x104   : > { %v2284_v48 = vpop.f32.mrf.mxu1  ;;  %1602 = vmatmul.msk.f32.gmra.mxu0 %vm367_vm0, %v326_v39  ;;  %1634 = vmatmul.msk.f32.gmra.mxu2 %vm367_vm0, %v358_v41  ;;  %v1258_v50 = vadd.f32 %v1257_v25, %v1256_v12  ;;  %v330_v25 = vld [vmem:[#allocation5 + $0xd8] sm:$0xff] }
 0x105   : > { %v1278_v52 = vadd.f32 %v1277_v34, %v1055_v47 }
 0x107   : > { %1666 = vmatmul.msk.f32.gmra.mxu1 %vm367_vm0, %v326_v39  ;;  %1698 = vmatmul.msk.f32.gmra.mxu3 %vm367_vm0, %v358_v41  ;;  %v694_v55 = vpop.f32.mrf.mxu2 }
 0x108   : > { %v1056_v57 = vmul.f32 %v694_v55, %v2083_v49 }
 0x109   : > { %v601_v60 = vpop.f32.mrf.mxu0 }
 0x10a   : > { %v1270_v2 = vadd.f32 %v1269_v44, %v1056_v57  ;;  %v903_v3 = vpop.f32.mrf.mxu3  ;;  %v994_v29 = vmul.f32 %v601_v60, %v2139_v53 }
 0x10b   : > { %v1057_v5 = vmul.f32 %v903_v3, %v2096_v1  ;;  %v329_v3 = vld [vmem:[#allocation5 + $0xd0] sm:$0xff] }
 0x10c   : > { %v1271_v6 = vrot.slane %v1270_v2, 4  ;;  %v810_v8 = vpop.f32.mrf.mxu1  ;;  %1603 = vmatmul.msk.f32.gmra.mxu0 %vm367_vm0, %v327_v61  ;;  %1635 = vmatmul.msk.f32.gmra.mxu2 %vm367_vm0, %v359_v62 }
 0x10d   : > { %v1279_v9 = vadd.f32 %v1278_v52, %v1057_v5  ;;  %v995_v45 = vmul.f32 %v810_v8, %v2144_v58  ;;  %v361_v5 = vld [vmem:[#allocation5 + $0x1d0] sm:$0xff] }
 0x10e   : > { %v1272_v15 = vadd.f32 %v1271_v6, %v1270_v2 }
 0x10f   : > { %v1280_v16 = vrot.slane %v1279_v9, 4  ;;  %1667 = vmatmul.msk.f32.gmra.mxu1 %vm367_vm0, %v327_v61  ;;  %1699 = vmatmul.msk.f32.gmra.mxu3 %vm367_vm0, %v359_v62  ;;  %v697_v11 = vpop.f32.mrf.mxu2  ;;  %v1267_v62 = vadd.f32 %v1266_v43, %v1265_v19 }
 0x110   : > { %v1273_v17 = vrot.slane %v1272_v15, 2  ;;  %v1058_v60 = vmul.f32 %v697_v11, %v2139_v53 }
 0x111   : > { %v1281_v20 = vadd.f32 %v1280_v16, %v1279_v9  ;;  %v604_v21 = vpop.f32.mrf.mxu0 }
 0x112   : > { %v1274_v26 = vadd.f32 %v1273_v17, %v1272_v15  ;;  %v906_v30 = vpop.f32.mrf.mxu3  ;;  %v996_v34 = vmul.f32 %v604_v21, %v2127_v40 }
 0x113   : > { %v1282_v35 = vrot.slane %v1281_v20, 2  ;;  %v1059_v12 = vmul.f32 %v906_v30, %v2144_v58 }
 0x114   : > { %v1275_v36 = vrot.slane %v1274_v26, 1  ;;  %v1142_v39 = vadd.f32 %v996_v34, %v994_v29  ;;  %v813_v41 = vpop.f32.mrf.mxu1  ;;  %1604 = vmatmul.msk.f32.gmra.mxu0 %vm367_vm0, %v328_v23  ;;  %1636 = vmatmul.msk.f32.gmra.mxu2 %vm367_vm0, %v360_v24 }
 0x115   : > { %v1283_v44 = vadd.f32 %v1282_v35, %v1281_v20  ;;  %v997_v47 = vmul.f32 %v813_v41, %v2133_v46 }
 0x116   : > { %v1276_v52 = vadd.f32 %v1275_v36, %v1274_v26  ;;  %v362_v26 = vld [vmem:[#allocation5 + $0x1d8] sm:$0xff] }
 0x117   : > { %v1284_v54 = vrot.slane %v1283_v44, 1  ;;  %v1151_v55 = vadd.f32 %v997_v47, %v995_v45  ;;  %1668 = vmatmul.msk.f32.gmra.mxu1 %vm367_vm0, %v328_v23  ;;  %1700 = vmatmul.msk.f32.gmra.mxu3 %vm367_vm0, %v360_v24  ;;  %v700_v57 = vpop.f32.mrf.mxu2 }
 0x118   : > { %v2305_v59 = vsel %vm1426_vm1, %v1276_v52, %v1258_v50  ;;  %v1060_v61 = vmul.f32 %v700_v57, %v2127_v40  ;;  %v331_v52 = vld [vmem:[#allocation5 + $0xe0] sm:$0xff] }
 0x119   : > { %v1285_v0 = vadd.f32 %v1284_v54, %v1283_v44  ;;  %v607_v2 = vpop.f32.mrf.mxu0  ;;  %v363_v54 = vld [vmem:[#allocation5 + $0x1e0] sm:$0xff] }
 0x11a   : > { %v1286_v6 = vadd.f32 %v1060_v61, %v1058_v60  ;;  %v909_v8 = vpop.f32.mrf.mxu3  ;;  %v998_v7 = vmul.f32 %v607_v2, %v2106_v13  ;;  %v981_v61 = vmul.f32 %v2222_v37, %v2133_v46  ;;  %v988_v2 = vmul.f32 %v2260_v14, %v2127_v40 }
 0x11b   : > { %v2311_v9 = vsel %vm1426_vm1, %v1285_v0, %v1267_v62  ;;  %v1061_v15 = vmul.f32 %v909_v8, %v2133_v46  ;;  %v978_v0 = vmul.f32 %v2212_v27, %v2139_v53  ;;  %v986_v37 = vmul.f32 %v2251_v4, %v2139_v53 }
 0x11c   : > { %v1143_v16 = vadd.f32 %v1142_v39, %v998_v7  ;;  %v816_v11 = vpop.f32.mrf.mxu1  ;;  %1605 = vmatmul.msk.f32.gmra.mxu0 %vm367_vm0, %v329_v3  ;;  %1637 = vmatmul.msk.f32.gmra.mxu2 %vm367_vm0, %v361_v5  ;;  %v990_v27 = vmul.f32 %v2270_v22, %v2106_v13  ;;  %v982_v14 = vmul.f32 %v2230_v42, %v2106_v13 }
 0x11d   : > { %v1295_v17 = vadd.f32 %v1061_v15, %v1059_v12  ;;  %v999_v19 = vmul.f32 %v816_v11, %v2117_v28  ;;  %v989_v15 = vmul.f32 %v2262_v18, %v2133_v46  ;;  %v983_v4 = vmul.f32 %v2234_v51, %v2117_v28 }
 0x11e   : > { %v1124_v11 = vadd.f32 %v988_v2, %v986_v37  ;;  %v992_v22 = vmul.f32 %v2281_v38, %v2083_v49  ;;  %v984_v42 = vmul.f32 %v2241_v56, %v2083_v49  ;;  %v987_v18 = vmul.f32 %v2254_v10, %v2144_v58  ;;  %v333_v37 = vld [vmem:[#allocation5 + $0xf0] sm:$0xff] }
 0x11f   : > { %v1152_v20 = vadd.f32 %v1151_v55, %v999_v19  ;;  %1669 = vmatmul.msk.f32.gmra.mxu1 %vm367_vm0, %v329_v3  ;;  %1701 = vmatmul.msk.f32.gmra.mxu3 %vm367_vm0, %v361_v5  ;;  %v703_v21 = vpop.f32.mrf.mxu2  ;;  %v980_v55 = vmul.f32 %v2220_v33, %v2127_v40  ;;  %v979_v33 = vmul.f32 %v2214_v31, %v2144_v58 }
 0x120   : > { %v1062_v23 = vmul.f32 %v703_v21, %v2106_v13  ;;  %v991_v19 = vmul.f32 %v2274_v32, %v2117_v28  ;;  %v993_v56 = vmul.f32 %v2284_v48, %v2096_v1  ;;  %v985_v32 = vmul.f32 %v2244_v63, %v2096_v1 }
 0x121   : > { %v610_v24 = vpop.f32.mrf.mxu0  ;;  %v1106_v8 = vadd.f32 %v980_v55, %v978_v0  ;;  %v1115_v12 = vadd.f32 %v981_v61, %v979_v33 }
 0x122   : > { %v1287_v29 = vadd.f32 %v1286_v6, %v1062_v23  ;;  %v912_v30 = vpop.f32.mrf.mxu3  ;;  %v1000_v34 = vmul.f32 %v610_v24, %v2083_v49  ;;  %v332_v23 = vld [vmem:[#allocation5 + $0xe8] sm:$0xff] }
 0x123   : > { %v1063_v35 = vmul.f32 %v912_v30, %v2117_v28  ;;  %v364_v24 = vld [vmem:[#allocation5 + $0x1e8] sm:$0xff]  ;;  %v1107_v30 = vadd.f32 %v1106_v8, %v982_v14 }
 0x124   : > { %v2323_v36 = vadd.f32 %v1143_v16, %v1000_v34  ;;  %v819_v39 = vpop.f32.mrf.mxu1  ;;  %1606 = vmatmul.msk.f32.gmra.mxu0 %vm367_vm0, %v330_v25  ;;  %1638 = vmatmul.msk.f32.gmra.mxu2 %vm367_vm0, %v362_v26  ;;  %v1133_v34 = vadd.f32 %v989_v15, %v987_v18 }
 0x125   : > { %v1296_v41 = vadd.f32 %v1295_v17, %v1063_v35  ;;  %v1001_v43 = vmul.f32 %v819_v39, %v2096_v1  ;;  %v1108_v48 = vadd.f32 %v1107_v30, %v984_v42 }
 0x126   : > { %v1145_v33 = vrot.slane %v2323_v36, 4 }
 0x127   : > { %v2328_v44 = vadd.f32 %v1152_v20, %v1001_v43  ;;  %1670 = vmatmul.msk.f32.gmra.mxu1 %vm367_vm0, %v330_v25  ;;  %1702 = vmatmul.msk.f32.gmra.mxu3 %vm367_vm0, %v362_v26  ;;  %v706_v45 = vpop.f32.mrf.mxu2  ;;  %v1125_v25 = vadd.f32 %v1124_v11, %v990_v27  ;;  %v365_v27 = vld [vmem:[#allocation5 + $0x1f0] sm:$0xff] }
 0x128   : > { %v1064_v47 = vmul.f32 %v706_v45, %v2083_v49  ;;  %v1134_v45 = vadd.f32 %v1133_v34, %v991_v19  ;;  %v1146_v19 = vadd.f32 %v1145_v33, %v2323_v36  ;;  %v334_v36 = vld [vmem:[#allocation5 + $0xf8] sm:$0xff] }
 0x129   : > { %v613_v50 = vpop.f32.mrf.mxu0  ;;  %v1126_v35 = vadd.f32 %v1125_v25, %v992_v22  ;;  %v1154_v22 = vrot.slane %v2328_v44, 4 }
 0x12a   : > { %v1288_v57 = vadd.f32 %v1287_v29, %v1064_v47  ;;  %v915_v60 = vpop.f32.mrf.mxu3  ;;  %v1002_v26 = vmul.f32 %v613_v50, %v2139_v53  ;;  %v1147_v30 = vrot.slane %v1146_v19, 2 }
 0x12b   : > { %v1065_v62 = vmul.f32 %v915_v60, %v2096_v1 }
 0x12c   : > { %v1289_v3 = vrot.slane %v1288_v57, 4  ;;  %v822_v5 = vpop.f32.mrf.mxu1  ;;  %1607 = vmatmul.msk.f32.gmra.mxu0 %vm367_vm0, %v331_v52  ;;  %1639 = vmatmul.msk.f32.gmra.mxu2 %vm367_vm0, %v363_v54 }
 0x12d   : > { %v1297_v6 = vadd.f32 %v1296_v41, %v1065_v62  ;;  %v1003_v50 = vmul.f32 %v822_v5, %v2144_v58  ;;  %v1127_v62 = vrot.slane %v1126_v35, 4 }
 0x12e   : > { %v1290_v7 = vadd.f32 %v1289_v3, %v1288_v57  ;;  %v1135_v57 = vadd.f32 %v1134_v45, %v993_v56  ;;  %v366_v56 = vld [vmem:[#allocation5 + $0x1f8] sm:$0xff] }
 0x12f   : > { %v1298_v16 = vrot.slane %v1297_v6, 4  ;;  %1671 = vmatmul.msk.f32.gmra.mxu1 %vm367_vm0, %v331_v52  ;;  %1703 = vmatmul.msk.f32.gmra.mxu3 %vm367_vm0, %v363_v54  ;;  %v709_v31 = vpop.f32.mrf.mxu2  ;;  %v1116_v54 = vadd.f32 %v1115_v12, %v983_v4  ;;  %v1128_v11 = vadd.f32 %v1127_v62, %v1126_v35 }
 0x130   : > { %v1291_v17 = vrot.slane %v1290_v7, 2  ;;  %v1066_v2 = vmul.f32 %v709_v31, %v2139_v53 }
 0x131   : > { %v1299_v20 = vadd.f32 %v1298_v16, %v1297_v6  ;;  %v616_v21 = vpop.f32.mrf.mxu0  ;;  %v1117_v5 = vadd.f32 %v1116_v54, %v985_v32  ;;  %v1136_v16 = vrot.slane %v1135_v57, 4  ;;  %v1148_v54 = vadd.f32 %v1147_v30, %v1146_v19 }
 0x132   : > { %v1292_v51 = vadd.f32 %v1291_v17, %v1290_v7  ;;  %v918_v29 = vpop.f32.mrf.mxu3  ;;  %v1004_v38 = vmul.f32 %v616_v21, %v2127_v40  ;;  %v1109_v7 = vrot.slane %v1108_v48, 4 }
 0x133   : > { %v1300_v10 = vrot.slane %v1299_v20, 2  ;;  %v1067_v31 = vmul.f32 %v918_v29, %v2144_v58  ;;  %v1118_v18 = vrot.slane %v1117_v5, 4 }
 0x134   : > { %v1293_v39 = vrot.slane %v1292_v51, 1  ;;  %v1160_v41 = vadd.f32 %v1004_v38, %v1002_v26  ;;  %v825_v43 = vpop.f32.mrf.mxu1  ;;  %1608 = vmatmul.msk.f32.gmra.mxu0 %vm367_vm0, %v332_v23  ;;  %1640 = vmatmul.msk.f32.gmra.mxu2 %vm367_vm0, %v364_v24  ;;  %v1110_v21 = vadd.f32 %v1109_v7, %v1108_v48  ;;  %v1155_v26 = vadd.f32 %v1154_v22, %v2328_v44 }
 0x135   : > { %v1301_v47 = vadd.f32 %v1300_v10, %v1299_v20  ;;  %v1005_v52 = vmul.f32 %v825_v43, %v2133_v46  ;;  %v1119_v38 = vadd.f32 %v1118_v18, %v1117_v5 }
 0x136   : > { %v1294_v55 = vadd.f32 %v1293_v39, %v1292_v51  ;;  %v1129_v51 = vrot.slane %v1128_v11, 2  ;;  %v1111_v10 = vrot.slane %v1110_v21, 2 }
 0x137   : > { %v1302_v63 = vrot.slane %v1301_v47, 1  ;;  %v1169_v60 = vadd.f32 %v1005_v52, %v1003_v50  ;;  %1672 = vmatmul.msk.f32.gmra.mxu1 %vm367_vm0, %v332_v23  ;;  %1704 = vmatmul.msk.f32.gmra.mxu3 %vm367_vm0, %v364_v24  ;;  %v712_v61 = vpop.f32.mrf.mxu2  ;;  %v1137_v23 = vadd.f32 %v1136_v16, %v1135_v57  ;;  %v1120_v44 = vrot.slane %v1119_v38, 2 }
 0x138   : > { %v2380_v0 = vsel %vm1428_vm2, %v1294_v55, %v2305_v59  ;;  %v1068_v3 = vmul.f32 %v712_v61, %v2127_v40  ;;  %v1130_v45 = vadd.f32 %v1129_v51, %v1128_v11  ;;  %v1112_v57 = vadd.f32 %v1111_v10, %v1110_v21 }
 0x139   : > { %v1303_v6 = vadd.f32 %v1302_v63, %v1301_v47  ;;  %v619_v8 = vpop.f32.mrf.mxu0  ;;  %v1156_v47 = vrot.slane %v1155_v26, 2 }
 0x13a   : > { %v1304_v12 = vadd.f32 %v1068_v3, %v1066_v2  ;;  %v921_v14 = vpop.f32.mrf.mxu3  ;;  %v1006_v15 = vmul.f32 %v619_v8, %v2106_v13  ;;  %v1131_v2 = vrot.slane %v1130_v45, 1  ;;  %v1149_v8 = vrot.slane %v1148_v54, 1 }
 0x13b   : > { %v2388_v59 = vsel %vm1428_vm2, %v1303_v6, %v2311_v9  ;;  %v1069_v4 = vmul.f32 %v921_v14, %v2133_v46  ;;  %v1157_v3 = vadd.f32 %v1156_v47, %v1155_v26  ;;  %v1121_v6 = vadd.f32 %v1120_v44, %v1119_v38 }
 0x13c   : > { %v1161_v17 = vadd.f32 %v1160_v41, %v1006_v15  ;;  %v828_v42 = vpop.f32.mrf.mxu1  ;;  %1609 = vmatmul.msk.f32.gmra.mxu0 %vm367_vm0, %v333_v37  ;;  %1641 = vmatmul.msk.f32.gmra.mxu2 %vm367_vm0, %v365_v27  ;;  %v1138_v41 = vrot.slane %v1137_v23, 2  ;;  %v1113_v7 = vrot.slane %v1112_v57, 1  ;;  %v1132_v11 = vadd.f32 %v1131_v2, %v1130_v45 }
 0x13d   : > { %v1313_v20 = vadd.f32 %v1069_v4, %v1067_v31  ;;  %v1007_v9 = vmul.f32 %v828_v42, %v2117_v28  ;;  %v1158_v22 = vrot.slane %v1157_v3, 1  ;;  %v1122_v19 = vrot.slane %v1121_v6, 1 }
 0x13f   : > { %v1170_v24 = vadd.f32 %v1169_v60, %v1007_v9  ;;  %1673 = vmatmul.msk.f32.gmra.mxu1 %vm367_vm0, %v333_v37  ;;  %1705 = vmatmul.msk.f32.gmra.mxu3 %vm367_vm0, %v365_v27  ;;  %v715_v25 = vpop.f32.mrf.mxu2  ;;  %v1139_v60 = vadd.f32 %v1138_v41, %v1137_v23  ;;  %v1114_v23 = vadd.f32 %v1113_v7, %v1112_v57 }
 0x140   : > { %v1070_v29 = vmul.f32 %v715_v25, %v2106_v13  ;;  %v1123_v10 = vadd.f32 %v1122_v19, %v1121_v6 }
 0x141   : > { %v622_v34 = vpop.f32.mrf.mxu0  ;;  %v1140_v16 = vrot.slane %v1139_v60, 1  ;;  %v1427_v30 = vsel %vm1426_vm1, %v1132_v11, %v1114_v23 }
 0x142   : > { %v1305_v32 = vadd.f32 %v1304_v12, %v1070_v29  ;;  %v924_v35 = vpop.f32.mrf.mxu3  ;;  %v1008_v39 = vmul.f32 %v622_v34, %v2083_v49  ;;  %v1159_v34 = vadd.f32 %v1158_v22, %v1157_v3 }
 0x143   : > { %v1071_v43 = vmul.f32 %v924_v35, %v2117_v28  ;;  %v1141_v51 = vadd.f32 %v1140_v16, %v1139_v60 }
 0x144   : > { %v1162_v50 = vadd.f32 %v1161_v17, %v1008_v39  ;;  %v831_v52 = vpop.f32.mrf.mxu1  ;;  %1610 = vmatmul.msk.f32.gmra.mxu0 %vm367_vm0, %v334_v36  ;;  %1642 = vmatmul.msk.f32.gmra.mxu2 %vm367_vm0, %v366_v56 }
 0x145   : > { %v1314_v48 = vadd.f32 %v1313_v20, %v1071_v43  ;;  %v1009_v55 = vmul.f32 %v831_v52, %v2096_v1  ;;  %v1150_v20 = vadd.f32 %v1149_v8, %v1148_v54  ;;  %v1440_v44 = vsel %vm1426_vm1, %v1141_v51, %v1123_v10 }
 0x146   : > { %v1163_v63 = vrot.slane %v1162_v50, 4 }
 0x147   : > { %v1171_v61 = vadd.f32 %v1170_v24, %v1009_v55  ;;  %1674 = vmatmul.msk.f32.gmra.mxu1 %vm367_vm0, %v334_v36  ;;  %1706 = vmatmul.msk.f32.gmra.mxu3 %vm367_vm0, %v366_v56  ;;  %v718_v62 = vpop.f32.mrf.mxu2  ;;  %v1441_v55 = vsel %vm1428_vm2, %v1159_v34, %v1440_v44 }
 0x148   : > { %v1164_v5 = vadd.f32 %v1163_v63, %v1162_v50  ;;  %v1072_v33 = vmul.f32 %v718_v62, %v2083_v49 }
 0x149   : > { %v1172_v37 = vrot.slane %v1171_v61, 4  ;;  %v625_v27 = vpop.f32.mrf.mxu0 }
 0x14a   : > { %v1165_v12 = vrot.slane %v1164_v5, 2  ;;  %v1306_v14 = vadd.f32 %v1305_v32, %v1072_v33  ;;  %v927_v15 = vpop.f32.mrf.mxu3  ;;  %v1429_v32 = vsel %vm1428_vm2, %v1150_v20, %v1427_v30  ;;  %v1010_v47 = vmul.f32 %v625_v27, %v2139_v53 }
 0x14b   : > { %v1173_v31 = vadd.f32 %v1172_v37, %v1171_v61  ;;  %v1073_v4 = vmul.f32 %v927_v15, %v2096_v1 }
 0x14c   : > { %v1166_v17 = vadd.f32 %v1165_v12, %v1164_v5  ;;  %v1307_v42 = vrot.slane %v1306_v14, 4  ;;  %v834_v18 = vpop.f32.mrf.mxu1 }
 0x14d   : > { %v1174_v9 = vrot.slane %v1173_v31, 2  ;;  %v1315_v21 = vadd.f32 %v1314_v48, %v1073_v4  ;;  %v1011_v2 = vmul.f32 %v834_v18, %v2144_v58 }
 0x14e   : > { %v1167_v24 = vrot.slane %v1166_v17, 1  ;;  %v1308_v25 = vadd.f32 %v1307_v42, %v1306_v14 }
 0x14f   : > { %v1175_v26 = vadd.f32 %v1174_v9, %v1173_v31  ;;  %v1316_v29 = vrot.slane %v1315_v21, 4  ;;  %v721_v38 = vpop.f32.mrf.mxu2 }
 0x150   : > { %v1168_v36 = vadd.f32 %v1167_v24, %v1166_v17  ;;  %v1309_v56 = vrot.slane %v1308_v25, 2  ;;  %v1074_v27 = vmul.f32 %v721_v38, %v2139_v53 }
 0x151   : > { %v1176_v35 = vrot.slane %v1175_v26, 1  ;;  %v1317_v39 = vadd.f32 %v1316_v29, %v1315_v21  ;;  %v628_v41 = vpop.f32.mrf.mxu0 }
 0x152   : > { %v2413_v43 = vsel %vm1430_vm3, %v1168_v36, %v1429_v32  ;;  %v1310_v45 = vadd.f32 %v1309_v56, %v1308_v25  ;;  %v930_v50 = vpop.f32.mrf.mxu3  ;;  %v1012_v52 = vmul.f32 %v628_v41, %v2127_v40 }
 0x153   : > { %v1177_v54 = vadd.f32 %v1176_v35, %v1175_v26  ;;  %v1318_v48 = vrot.slane %v1317_v39, 2  ;;  %v1075_v11 = vmul.f32 %v930_v50, %v2144_v58 }
 0x154   : > { %v1311_v57 = vrot.slane %v1310_v45, 1  ;;  %v1178_v63 = vadd.f32 %v1012_v52, %v1010_v47  ;;  %v837_v60 = vpop.f32.mrf.mxu1 }
 0x155   : > { %v2420_v61 = vsel %vm1430_vm3, %v1177_v54, %v1441_v55  ;;  %v1319_v62 = vadd.f32 %v1318_v48, %v1317_v39  ;;  %v1013_v3 = vmul.f32 %v837_v60, %v2133_v46 }
 0x156   : > { %v1312_v5 = vadd.f32 %v1311_v57, %v1310_v45 }
 0x157   : > { %v1320_v33 = vrot.slane %v1319_v62, 1  ;;  %v1187_v6 = vadd.f32 %v1013_v3, %v1011_v2  ;;  %v724_v8 = vpop.f32.mrf.mxu2 }
 0x158   : > { %v2426_v37 = vsel %vm1430_vm3, %v1312_v5, %v2380_v0  ;;  %v1076_v7 = vmul.f32 %v724_v8, %v2127_v40 }
 0x159   : > { %v1321_v12 = vadd.f32 %v1320_v33, %v1319_v62  ;;  %v631_v14 = vpop.f32.mrf.mxu0 }
 0x15a   : > { %v1322_v15 = vadd.f32 %v1076_v7, %v1074_v27  ;;  %v933_v16 = vpop.f32.mrf.mxu3  ;;  %v1014_v31 = vmul.f32 %v631_v14, %v2106_v13 }
 0x15b   : > { %v2433_v4 = vsel %vm1430_vm3, %v1321_v12, %v2388_v59  ;;  %v1077_v22 = vmul.f32 %v933_v16, %v2133_v46 }
 0x15c   : > { %v1179_v0 = vadd.f32 %v1178_v63, %v1014_v31  ;;  %v840_v17 = vpop.f32.mrf.mxu1 }
 0x15d   : > { %v1331_v42 = vadd.f32 %v1077_v22, %v1075_v11  ;;  %v1015_v18 = vmul.f32 %v840_v17, %v2117_v28 }
 0x15f   : > { %v1188_v19 = vadd.f32 %v1187_v6, %v1015_v18  ;;  %v727_v20 = vpop.f32.mrf.mxu2 }
 0x160   : > { %v1078_v9 = vmul.f32 %v727_v20, %v2106_v13 }
 0x161   : > { %v634_v21 = vpop.f32.mrf.mxu0 }
 0x162   : > { %v1323_v23 = vadd.f32 %v1322_v15, %v1078_v9  ;;  %v936_v24 = vpop.f32.mrf.mxu3  ;;  %v1016_v25 = vmul.f32 %v634_v21, %v2083_v49 }
 0x163   : > { %v1079_v59 = vmul.f32 %v936_v24, %v2117_v28 }
 0x164   : > { %v1180_v51 = vadd.f32 %v1179_v0, %v1016_v25  ;;  %v843_v26 = vpop.f32.mrf.mxu1 }
 0x165   : > { %v1332_v29 = vadd.f32 %v1331_v42, %v1079_v59  ;;  %v1017_v38 = vmul.f32 %v843_v26, %v2096_v1 }
 0x166   : > { %v1181_v30 = vrot.slane %v1180_v51, 4 }
 0x167   : > { %v1189_v34 = vadd.f32 %v1188_v19, %v1017_v38  ;;  %v730_v36 = vpop.f32.mrf.mxu2 }
 0x168   : > { %v1182_v56 = vadd.f32 %v1181_v30, %v1180_v51  ;;  %v1080_v10 = vmul.f32 %v730_v36, %v2083_v49 }
 0x169   : > { %v1190_v32 = vrot.slane %v1189_v34, 4  ;;  %v637_v35 = vpop.f32.mrf.mxu0 }
 0x16a   : > { %v1183_v39 = vrot.slane %v1182_v56, 2  ;;  %v1324_v41 = vadd.f32 %v1323_v23, %v1080_v10  ;;  %v939_v45 = vpop.f32.mrf.mxu3  ;;  %v1018_v12 = vmul.f32 %v637_v35, %v2139_v53 }
 0x16b   : > { %v1191_v47 = vadd.f32 %v1190_v32, %v1189_v34  ;;  %v1081_v50 = vmul.f32 %v939_v45, %v2096_v1 }
 0x16c   : > { %v1184_v52 = vadd.f32 %v1183_v39, %v1182_v56  ;;  %v1325_v44 = vrot.slane %v1324_v41, 4  ;;  %v846_v54 = vpop.f32.mrf.mxu1 }
 0x16d   : > { %v1192_v48 = vrot.slane %v1191_v47, 2  ;;  %v1333_v55 = vadd.f32 %v1332_v29, %v1081_v50  ;;  %v1019_v18 = vmul.f32 %v846_v54, %v2144_v58 }
 0x16e   : > { %v1185_v57 = vrot.slane %v1184_v52, 1  ;;  %v1326_v63 = vadd.f32 %v1325_v44, %v1324_v41 }
 0x16f   : > { %v1193_v60 = vadd.f32 %v1192_v48, %v1191_v47  ;;  %v1334_v62 = vrot.slane %v1333_v55, 4  ;;  %v733_v2 = vpop.f32.mrf.mxu2 }
 0x170   : > { %v1186_v3 = vadd.f32 %v1185_v57, %v1184_v52  ;;  %v1327_v5 = vrot.slane %v1326_v63, 2  ;;  %v1082_v24 = vmul.f32 %v733_v2, %v2139_v53 }
 0x171   : > { %v1194_v33 = vrot.slane %v1193_v60, 1  ;;  %v1335_v6 = vadd.f32 %v1334_v62, %v1333_v55  ;;  %v640_v8 = vpop.f32.mrf.mxu0 }
 0x172   : > { %v2446_v27 = vsel %vm1432_vm4, %v1186_v3, %v2413_v43  ;;  %v1328_v7 = vadd.f32 %v1327_v5, %v1326_v63  ;;  %v942_v14 = vpop.f32.mrf.mxu3  ;;  %v1020_v15 = vmul.f32 %v640_v8, %v2127_v40 }
 0x173   : > { %v1195_v16 = vadd.f32 %v1194_v33, %v1193_v60  ;;  %v1336_v31 = vrot.slane %v1335_v6, 2  ;;  %v1083_v30 = vmul.f32 %v942_v14, %v2144_v58 }
 0x174   : > { %v1329_v11 = vrot.slane %v1328_v7, 1  ;;  %v1196_v22 = vadd.f32 %v1020_v15, %v1018_v12  ;;  %v849_v0 = vpop.f32.mrf.mxu1 }
 0x175   : > { %v2452_v17 = vsel %vm1432_vm4, %v1195_v16, %v2420_v61  ;;  %v1337_v42 = vadd.f32 %v1336_v31, %v1335_v6  ;;  %v1021_v43 = vmul.f32 %v849_v0, %v2133_v46 }
 0x176   : > { %v1330_v19 = vadd.f32 %v1329_v11, %v1328_v7 }
 0x177   : > { %v1338_v20 = vrot.slane %v1337_v42, 1  ;;  %v1205_v9 = vadd.f32 %v1021_v43, %v1019_v18  ;;  %v736_v21 = vpop.f32.mrf.mxu2 }
 0x178   : > { %v2458_v23 = vsel %vm1432_vm4, %v1330_v19, %v2426_v37  ;;  %v1084_v25 = vmul.f32 %v736_v21, %v2127_v40 }
 0x179   : > { %v1339_v59 = vadd.f32 %v1338_v20, %v1337_v42  ;;  %v643_v61 = vpop.f32.mrf.mxu0 }
 0x17a   : > { %v1340_v51 = vadd.f32 %v1084_v25, %v1082_v24  ;;  %v945_v26 = vpop.f32.mrf.mxu3  ;;  %v1022_v29 = vmul.f32 %v643_v61, %v2106_v13 }
 0x17b   : > { %v2465_v38 = vsel %vm1432_vm4, %v1339_v59, %v2433_v4  ;;  %v1085_v34 = vmul.f32 %v945_v26, %v2133_v46 }
 0x17c   : > { %v1197_v37 = vadd.f32 %v1196_v22, %v1022_v29  ;;  %v852_v36 = vpop.f32.mrf.mxu1 }
 0x17d   : > { %v1349_v56 = vadd.f32 %v1085_v34, %v1083_v30  ;;  %v1023_v10 = vmul.f32 %v852_v36, %v2117_v28 }
 0x17f   : > { %v1206_v32 = vadd.f32 %v1205_v9, %v1023_v10  ;;  %v739_v35 = vpop.f32.mrf.mxu2 }
 0x180   : > { %v1086_v39 = vmul.f32 %v739_v35, %v2106_v13 }
 0x181   : > { %v646_v41 = vpop.f32.mrf.mxu0 }
 0x182   : > { %v1341_v45 = vadd.f32 %v1340_v51, %v1086_v39  ;;  %v948_v47 = vpop.f32.mrf.mxu3  ;;  %v1024_v50 = vmul.f32 %v646_v41, %v2083_v49 }
 0x183   : > { %v1087_v4 = vmul.f32 %v948_v47, %v2117_v28 }
 0x184   : > { %v1198_v52 = vadd.f32 %v1197_v37, %v1024_v50  ;;  %v855_v44 = vpop.f32.mrf.mxu1 }
 0x185   : > { %v1350_v54 = vadd.f32 %v1349_v56, %v1087_v4  ;;  %v1025_v48 = vmul.f32 %v855_v44, %v2096_v1 }
 0x186   : > { %v1199_v55 = vrot.slane %v1198_v52, 4 }
 0x187   : > { %v1207_v57 = vadd.f32 %v1206_v32, %v1025_v48  ;;  %v742_v63 = vpop.f32.mrf.mxu2 }
 0x188   : > { %v1200_v60 = vadd.f32 %v1199_v55, %v1198_v52  ;;  %v1088_v62 = vmul.f32 %v742_v63, %v2083_v49 }
 0x189   : > { %v1208_v2 = vrot.slane %v1207_v57, 4  ;;  %v649_v3 = vpop.f32.mrf.mxu0 }
 0x18a   : > { %v1201_v5 = vrot.slane %v1200_v60, 2  ;;  %v1342_v33 = vadd.f32 %v1341_v45, %v1088_v62  ;;  %v951_v6 = vpop.f32.mrf.mxu3 }
 0x18b   : > { %v1209_v8 = vadd.f32 %v1208_v2, %v1207_v57  ;;  %v1089_v7 = vmul.f32 %v951_v6, %v2096_v1 }
 0x18c   : > { %v1202_v12 = vadd.f32 %v1201_v5, %v1200_v60  ;;  %v1343_v14 = vrot.slane %v1342_v33, 4  ;;  %v858_v15 = vpop.f32.mrf.mxu1 }
 0x18d   : > { %v1210_v16 = vrot.slane %v1209_v8, 2  ;;  %v1351_v31 = vadd.f32 %v1350_v54, %v1089_v7  ;;  %v1027_v2 = vmul.f32 %v858_v15, %v2144_v58 }
 0x18e   : > { %v1203_v11 = vrot.slane %v1202_v12, 1  ;;  %v1344_v22 = vadd.f32 %v1343_v14, %v1342_v33 }
 0x18f   : > { %v1211_v0 = vadd.f32 %v1210_v16, %v1209_v8  ;;  %v1352_v42 = vrot.slane %v1351_v31, 4  ;;  %v745_v18 = vpop.f32.mrf.mxu2 }
 0x190   : > { %v1204_v43 = vadd.f32 %v1203_v11, %v1202_v12  ;;  %v1345_v19 = vrot.slane %v1344_v22, 2  ;;  %v1090_v14 = vmul.f32 %v745_v18, %v2139_v53 }
 0x191   : > { %v1212_v20 = vrot.slane %v1211_v0, 1  ;;  %v1353_v9 = vadd.f32 %v1352_v42, %v1351_v31  ;;  %v652_v21 = vpop.f32.mrf.mxu0 }
 0x192   : > { %v2478_v24 = vsel %vm1434_vm5, %v1204_v43, %v2446_v27  ;;  %v1346_v25 = vadd.f32 %v1345_v19, %v1344_v22  ;;  %v954_v59 = vpop.f32.mrf.mxu3  ;;  %v1028_v48 = vmul.f32 %v652_v21, %v2127_v40 }
 0x193   : > { %v1213_v61 = vadd.f32 %v1212_v20, %v1211_v0  ;;  %v1354_v51 = vrot.slane %v1353_v9, 2  ;;  %v1091_v43 = vmul.f32 %v954_v59, %v2144_v58 }
 0x194   : > { %v1347_v26 = vrot.slane %v1346_v25, 1  ;;  %v861_v29 = vpop.f32.mrf.mxu1 }
 0x195   : > { %v2482_v30 = vsel %vm1434_vm5, %v1213_v61, %v2452_v17  ;;  %v1355_v34 = vadd.f32 %v1354_v51, %v1353_v9  ;;  %v1029_v63 = vmul.f32 %v861_v29, %v2133_v46 }
 0x196   : > { %v1348_v37 = vadd.f32 %v1347_v26, %v1346_v25 }
 0x197   : > { %v1356_v36 = vrot.slane %v1355_v34, 1  ;;  %v748_v56 = vpop.f32.mrf.mxu2  ;;  %v1223_v7 = vadd.f32 %v1029_v63, %v1027_v2 }
 0x198   : > { %v2486_v10 = vsel %vm1434_vm5, %v1348_v37, %v2458_v23  ;;  %v1026_v23 = vmul.f32 %v649_v3, %v2139_v53  ;;  %v1092_v6 = vmul.f32 %v748_v56, %v2127_v40 }
 0x199   : > { %v1357_v27 = vadd.f32 %v1356_v36, %v1355_v34  ;;  %v655_v32 = vpop.f32.mrf.mxu0 }
 0x19a   : > { %v957_v35 = vpop.f32.mrf.mxu3  ;;  %v1030_v55 = vmul.f32 %v655_v32, %v2106_v13  ;;  %v1358_v0 = vadd.f32 %v1092_v6, %v1090_v14 }
 0x19b   : > { %v2490_v39 = vsel %vm1434_vm5, %v1357_v27, %v2465_v38  ;;  %v1214_v38 = vadd.f32 %v1028_v48, %v1026_v23  ;;  %v1093_v11 = vmul.f32 %v957_v35, %v2133_v46 }
 0x19c   : > { %v864_v41 = vpop.f32.mrf.mxu1 }
 0x19d   : > { %v1031_v5 = vmul.f32 %v864_v41, %v2117_v28  ;;  %v1215_v8 = vadd.f32 %v1214_v38, %v1030_v55  ;;  %v1367_v61 = vadd.f32 %v1093_v11, %v1091_v43 }
 0x19f   : > { %v751_v45 = vpop.f32.mrf.mxu2  ;;  %v1224_v22 = vadd.f32 %v1223_v7, %v1031_v5 }
 0x1a0   : > { %v1094_v16 = vmul.f32 %v751_v45, %v2106_v13 }
 0x1a1   : > { %v658_v47 = vpop.f32.mrf.mxu0 }
 0x1a2   : > { %v960_v17 = vpop.f32.mrf.mxu3  ;;  %v1032_v60 = vmul.f32 %v658_v47, %v2083_v49  ;;  %v1359_v9 = vadd.f32 %v1358_v0, %v1094_v16 }
 0x1a3   : > { %v1095_v19 = vmul.f32 %v960_v17, %v2117_v28 }
 0x1a4   : > { %v867_v50 = vpop.f32.mrf.mxu1  ;;  %v1216_v31 = vadd.f32 %v1215_v8, %v1032_v60 }
 0x1a5   : > { %v1033_v3 = vmul.f32 %v867_v50, %v2096_v1  ;;  %v1368_v29 = vadd.f32 %v1367_v61, %v1095_v19 }
 0x1a6   : > { %v1217_v21 = vrot.slane %v1216_v31, 4 }
 0x1a7   : > { %v754_v4 = vpop.f32.mrf.mxu2  ;;  %v1225_v20 = vadd.f32 %v1224_v22, %v1033_v3 }
 0x1a8   : > { %v1096_v15 = vmul.f32 %v754_v4, %v2083_v49  ;;  %v1218_v56 = vadd.f32 %v1217_v21, %v1216_v31 }
 0x1a9   : > { %v661_v52 = vpop.f32.mrf.mxu0  ;;  %v1226_v34 = vrot.slane %v1225_v20, 4 }
 0x1aa   : > { %v963_v44 = vpop.f32.mrf.mxu3  ;;  %v1360_v26 = vadd.f32 %v1359_v9, %v1096_v15  ;;  %v1034_v59 = vmul.f32 %v661_v52, %v2139_v53  ;;  %v1219_v50 = vrot.slane %v1218_v56, 2 }
 0x1ab   : > { %v1097_v18 = vmul.f32 %v963_v44, %v2096_v1  ;;  %v1227_v47 = vadd.f32 %v1226_v34, %v1225_v20 }
 0x1ac   : > { %v870_v54 = vpop.f32.mrf.mxu1  ;;  %v1361_v35 = vrot.slane %v1360_v26, 4 }
 0x1ad   : > { %v1369_v27 = vadd.f32 %v1368_v29, %v1097_v18  ;;  %v1035_v4 = vmul.f32 %v870_v54, %v2144_v58  ;;  %v1228_v2 = vrot.slane %v1227_v47, 2  ;;  %v1220_v54 = vadd.f32 %v1219_v50, %v1218_v56 }
 0x1ae   : > { %v1362_v60 = vadd.f32 %v1361_v35, %v1360_v26 }
 0x1af   : > { %v757_v57 = vpop.f32.mrf.mxu2  ;;  %v1370_v23 = vrot.slane %v1369_v27, 4 }
 0x1b0   : > { %v1098_v5 = vmul.f32 %v757_v57, %v2139_v53  ;;  %v1363_v11 = vrot.slane %v1362_v60, 2  ;;  %v1229_v57 = vadd.f32 %v1228_v2, %v1227_v47 }
 0x1b1   : > { %v664_v62 = vpop.f32.mrf.mxu0 }
 0x1b2   : > { %v966_v33 = vpop.f32.mrf.mxu3  ;;  %v1036_v37 = vmul.f32 %v664_v62, %v2127_v40  ;;  %v1364_v18 = vadd.f32 %v1363_v11, %v1362_v60 }
 0x1b3   : > { %v1099_v22 = vmul.f32 %v966_v33, %v2144_v58  ;;  %v1230_v33 = vrot.slane %v1229_v57, 1 }
 0x1b4   : > { %v873_v12 = vpop.f32.mrf.mxu1  ;;  %v1232_v17 = vadd.f32 %v1036_v37, %v1034_v59  ;;  %v1365_v59 = vrot.slane %v1364_v18, 1 }
 0x1b5   : > { %v1037_v41 = vmul.f32 %v873_v12, %v2133_v46 }
 0x1b7   : > { %v760_v42 = vpop.f32.mrf.mxu2  ;;  %v1241_v62 = vadd.f32 %v1037_v41, %v1035_v4  ;;  %v1231_v41 = vadd.f32 %v1230_v33, %v1229_v57 }
 0x1b8   : > { %v1100_v55 = vmul.f32 %v760_v42, %v2127_v40  ;;  %v1371_v40 = vadd.f32 %v1370_v23, %v1369_v27  ;;  %v1366_v23 = vadd.f32 %v1365_v59, %v1364_v18 }
 0x1b9   : > { %v667_v25 = vpop.f32.mrf.mxu0 }
 0x1ba   : > { %v969_v51 = vpop.f32.mrf.mxu3  ;;  %v1038_v32 = vmul.f32 %v667_v25, %v2106_v13  ;;  %v1376_v16 = vadd.f32 %v1100_v55, %v1098_v5  ;;  %v1372_v9 = vrot.slane %v1371_v40, 2  ;;  %v1452_v5 = vsel %vm1436_vm6, %v1366_v23, %v2486_v10 }
 0x1bb   : > { %v1101_v3 = vmul.f32 %v969_v51, %v2133_v46  ;;  %v1221_v46 = vrot.slane %v1220_v54, 1 }
 0x1bc   : > { %v876_v36 = vpop.f32.mrf.mxu1  ;;  %v1233_v63 = vadd.f32 %v1232_v17, %v1038_v32 }
 0x1bd   : > { %v1039_v44 = vmul.f32 %v876_v36, %v2117_v28  ;;  %v1385_v19 = vadd.f32 %v1101_v3, %v1099_v22  ;;  %v1222_v34 = vadd.f32 %v1221_v46, %v1220_v54  ;;  %v1373_v36 = vadd.f32 %v1372_v9, %v1371_v40 }
 0x1bf   : > { %v763_v45 = vpop.f32.mrf.mxu2  ;;  %v1242_v12 = vadd.f32 %v1241_v62, %v1039_v44  ;;  %v1374_v4 = vrot.slane %v1373_v36, 1 }
 0x1c0   : > { %v1102_v6 = vmul.f32 %v763_v45, %v2106_v13 }
 0x1c1   : > { %v670_v48 = vpop.f32.mrf.mxu0  ;;  %v1375_v62 = vadd.f32 %v1374_v4, %v1373_v36 }
 0x1c2   : > { %v972_v38 = vpop.f32.mrf.mxu3  ;;  %v1040_v52 = vmul.f32 %v670_v48, %v2083_v49  ;;  %v1377_v13 = vadd.f32 %v1376_v16, %v1102_v6 }
 0x1c3   : > { %v1103_v0 = vmul.f32 %v972_v38, %v2117_v28  ;;  %v1445_v38 = vsel %vm1436_vm6, %v1231_v41, %v2482_v30 }
 0x1c4   : > { %v1234_v8 = vadd.f32 %v1233_v63, %v1040_v52  ;;  %v879_v7 = vpop.f32.mrf.mxu1 }
 0x1c5   : > { %v1041_v14 = vmul.f32 %v879_v7, %v2096_v1  ;;  %v1386_v51 = vadd.f32 %v1385_v19, %v1103_v0  ;;  %v1459_v7 = vsel %vm1436_vm6, %v1375_v62, %v2490_v39 }
 0x1c6   : > { %v1235_v31 = vrot.slane %v1234_v8, 4 }
 0x1c7   : > { %v1243_v15 = vadd.f32 %v1242_v12, %v1041_v14  ;;  %v766_v53 = vpop.f32.mrf.mxu2 }
 0x1c8   : > { %v1236_v42 = vadd.f32 %v1235_v31, %v1234_v8  ;;  %v1104_v43 = vmul.f32 %v766_v53, %v2083_v49 }
 0x1c9   : > { %v1244_v20 = vrot.slane %v1243_v15, 4 }
 0x1ca   : > { %v1237_v21 = vrot.slane %v1236_v42, 2  ;;  %v1378_v25 = vadd.f32 %v1377_v13, %v1104_v43  ;;  %v975_v61 = vpop.f32.mrf.mxu3 }
 0x1cb   : > { %v1245_v58 = vadd.f32 %v1244_v20, %v1243_v15  ;;  %v1105_v28 = vmul.f32 %v975_v61, %v2096_v1  ;;  %v1437_v1 = vsel %vm1436_vm6, %v1222_v34, %v2478_v24 }
 0x1cc   : > { %v1238_v26 = vadd.f32 %v1237_v21, %v1236_v42  ;;  %v1379_v29 = vrot.slane %v1378_v25, 4 }
 0x1cd   : > { %v1246_v49 = vrot.slane %v1245_v58, 2  ;;  %v1387_v37 = vadd.f32 %v1386_v51, %v1105_v28 }
 0x1ce   : > { %v1239_v56 = vrot.slane %v1238_v26, 1  ;;  %v1380_v27 = vadd.f32 %v1379_v29, %v1378_v25 }
 0x1cf   : > { %v1247_v32 = vadd.f32 %v1246_v49, %v1245_v58  ;;  %v1388_v35 = vrot.slane %v1387_v37, 4 }
 0x1d0   : > { %v1240_v45 = vadd.f32 %v1239_v56, %v1238_v26  ;;  %v1381_v47 = vrot.slane %v1380_v27, 2 }
 0x1d1   : > { %v1248_v17 = vrot.slane %v1247_v32, 1  ;;  %v1389_v50 = vadd.f32 %v1388_v35, %v1387_v37 }
 0x1d2   : > { %v1439_v44 = vsel %vm1438_vm7, %v1240_v45, %v1437_v1  ;;  %v1382_v48 = vadd.f32 %v1381_v47, %v1380_v27 }
 0x1d3   : > { %1465 = vst [vmem:[%s180_s8] sm:$0xff] %v1439_v44  ;;  %v1249_v55 = vadd.f32 %v1248_v17, %v1247_v32  ;;  %v1390_v63 = vrot.slane %v1389_v50, 2 }
 0x1d4   : > { %v1383_v52 = vrot.slane %v1382_v48, 1 }
 0x1d5   : > { %v1446_v24 = vsel %vm1438_vm7, %v1249_v55, %v1445_v38  ;;  %v1391_v60 = vadd.f32 %v1390_v63, %v1389_v50 }
 0x1d6   : > { %1466 = vst [vmem:[%s180_s8 + $0x8] sm:$0xff] %v1446_v24  ;;  %v1384_v2 = vadd.f32 %v1383_v52, %v1382_v48 }
 0x1d7   : > { %v1392_v6 = vrot.slane %v1391_v60, 1 }
 0x1d8   : > { %v1453_v8 = vsel %vm1438_vm7, %v1384_v2, %v1452_v5 }
 0x1d9   : > { %1467 = vst [vmem:[%s180_s8 + $0x10] sm:$0xff] %v1453_v8  ;;  %v1393_v30 = vadd.f32 %v1392_v6, %v1391_v60 }
 0x1db   : > { %v1460_v54 = vsel %vm1438_vm7, %v1393_v30, %v1459_v7 }
 0x1dc   : > { %1468 = vst [vmem:[%s180_s8 + $0x18] sm:$0xff] %v1460_v54 }
 0x1dd   : > { %1874 = shalt.err (!%p1871_p10)
}
 0x1de   : > { %s1925_s6 = smov 256   ;;  %s1926_s7 = smov 512  }
 0x1df   : > { %s1927_s14 = smov 16  }
 0x1e0   : > { %1728 = dma.vmem_to_hbm [thread:$0]  (%p2010_p7), %s1483_s13, 512, %s1485_s22, %s1470_s24, %s1925_s6, %s1926_s7, %s1927_s14  }
 0x1e1 PF: > { %s1499_s21 = sand.u32 1, %s1905_s9   ;;  %p2578_p12 = scmp.ge.s32.totalorder %s1917_s12, 2 }
 0x1e2   : > { %s1500_s15 = scalar_lea.sflag [#allocation4], %s1499_s21 }
 0x1e3   : > { %p1739_p13 = pnand %p2578_p12, %p1978_p6 }
 0x1e5   : > { %p1740_p0 = pneg %p1739_p13 }
 0x1e7   : > { %1900 = dma.done.wait (%p1740_p0), %s1500_s15, 512  }
 0x1e8   : > { %1902 = vsyncadd (%p1740_p0), %s1500_s15, 4294966784  ;;  %p16_p3 = scmp.ge.s32.totalorder %s1996_s23, 4   ;;  %s2579_s9 = smov %s1909_s10 }
 0x1e9   : > { %s2580_s10 = smov %s1913_s11  ;;  %s2581_s11 = smov %s2006_s28 }
 0x1ea   : > { %s2582_s12 = smov %s1996_s23  ;;  %18 = sbr.rel (!%p16_p3) target bundleno = 6 (0x6), region = 77 }
 0x1ef   :  { %1506 = vsyncpa [#allocation3], 1 }
 0x1f0   :  { %1508 = vsyncpa [#allocation3 + $0x1], 1 }
 0x1f1   :  { %1509 = vsyncpa [#allocation6], 1 }
 0x1f2   :  { %1510 = vsyncpa [#allocation4], 1 }
 0x1f3   :  { %1512 = vsyncpa [#allocation4 + $0x1], 1 }

</bundles_post_ra>
